<compile_context>
chip_gen: v6e
topology: v6e:2x2x1
jax: 0.10.0
libtpu: 0.0.40
codegen_flags: <defaults>
</compile_context>

<pallas_src>
import math
import functools

import jax
import jax.numpy as jnp
from jax.experimental import pallas as pl
from jax.experimental.pallas import tpu as pltpu

# ----------------------------- small config ---------------------------------
BATCH = 2
SEQ = 8
HIDDEN = 128
NUM_HEADS = 2
HEAD_DIM = HIDDEN // NUM_HEADS
INTERMEDIATE = 256
NUM_LAYERS = 2
VOCAB = 120
TYPE_VOCAB = 2
MAX_POS = 64
NUM_LABELS = 4
LN_EPS = 1e-12
LANE = 128   # lane-dense padded classifier width (real labels = first 4 cols)
VPAD = 128   # padded gather table rows: [0,VOCAB) word, [VOCAB,VOCAB+2) token type

# kernel unpack order for the resident weights
WEIGHT_ORDER = ("gather_tab", "pos_emb", "emb_ln_g", "emb_ln_b",
                "wqkv", "bqkv", "wo", "bo", "ln1_g", "ln1_b",
                "w1", "bf1", "w2", "bf2", "ln2_g", "ln2_b",
                "cls_w", "cls_b")


# ----------------------------- kernel helpers --------------------------------
def _layer_norm(x, g, b):
    mu = jnp.mean(x, axis=-1, keepdims=True)
    var = jnp.mean((x - mu) ** 2, axis=-1, keepdims=True)
    return (x - mu) * jax.lax.rsqrt(var + LN_EPS) * g + b


def _gelu(x):
    # TODO(synk): ELECTRA uses exact erf GELU; tanh approximation kept for
    # robust Mosaic lowering (numerically ~identical at these magnitudes).
    return jax.nn.gelu(x, approximate=True)


# ----------------------------- fused Pallas kernel ----------------------------
def make_fused_kernel(with_loss, batch, seq):
    """Whole-model kernel: in-kernel embedding gather -> embed-LN ->
    NUM_LAYERS encoder layers -> classifier (-> cross-entropy if with_loss).
    One block, no grid."""
    BS = batch * seq

    def kernel(*refs):
        if with_loss:
            wid_ref, tid_ref, mask_ref, *w_refs, labels_ref, out_ref = refs
        else:
            wid_ref, tid_ref, mask_ref, *w_refs, out_ref = refs
        (tab_ref, pos_ref, eg_ref, eb_ref,
         wqkv_ref, bqkv_ref, wo_ref, bo_ref, g1_ref, b1_ref,
         w1_ref, bf1_ref, w2_ref, bf2_ref, g2_ref, b2_ref,
         clsw_ref, clsb_ref) = w_refs

        f32, bf16 = jnp.float32, jnp.bfloat16
        B, S, H, HD = batch, seq, HIDDEN, HEAD_DIM

        # --- in-kernel embedding gather via one-hot MXU matmul ---------------
        # one matmul fetches word + token-type embeddings (disjoint table rows)
        classes = jax.lax.broadcasted_iota(jnp.int32, (BS, VPAD), 1)
        one_hot = (jnp.where(classes == wid_ref[...], 1.0, 0.0)
                   + jnp.where(classes == (tid_ref[...] + VOCAB), 1.0, 0.0))
        emb = jnp.dot(one_hot.astype(bf16), tab_ref[...],
                      preferred_element_type=f32)                         # (BS,H)
        pos = pos_ref[0:S, :]                                             # (S,H)
        emb = emb + jnp.concatenate([pos] * B, axis=0)                    # (BS,H)

        # --- embedding LayerNorm ---------------------------------------------
        x = _layer_norm(emb, eg_ref[...], eb_ref[...])                    # (BS,H) f32

        # --- additive attention bias, materialized ONCE as (B,S,S) ------------
        mask_f = mask_ref[...].astype(f32)                                # (B,S)
        attn_bias = jnp.broadcast_to(((1.0 - mask_f) * -10000.0)[:, None, :],
                                     (B, S, S))                           # (B,S,S)

        scale = 1.0 / math.sqrt(HD)
        for li in range(NUM_LAYERS):                                      # static unroll
            # ---- fused Q/K/V projection: one (BS,H)x(H,3H) bf16 MXU pass ----
            qkv = jnp.dot(x.astype(bf16), wqkv_ref[li],
                          preferred_element_type=f32) + bqkv_ref[li]      # (BS,3H)
            q = qkv[:, 0 * H:1 * H].reshape(B, S, H)
            k = qkv[:, 1 * H:2 * H].reshape(B, S, H)
            v = qkv[:, 2 * H:3 * H].reshape(B, S, H)

            # ---- attention: per-head, contexts kept in vregs (no scratch) ----
            ctx_heads = []
            for h in range(NUM_HEADS):
                sl = slice(h * HD, (h + 1) * HD)
                qh = q[:, :, sl].astype(bf16)
                kh = k[:, :, sl].astype(bf16)
                vh = v[:, :, sl].astype(bf16)
                s = jnp.einsum("bqd,bkd->bqk", qh, kh,
                               preferred_element_type=f32) * scale        # (B,S,S)
                s = s + attn_bias
                s = s - jnp.max(s, axis=-1, keepdims=True)
                p = jnp.exp(s)
                p = p * pl.reciprocal(jnp.sum(p, axis=-1, keepdims=True),
                                      approx=True)
                ctx_heads.append(
                    jnp.einsum("bqk,bkd->bqd", p.astype(bf16), vh,
                               preferred_element_type=f32))               # (B,S,HD)
            ctx = jnp.concatenate(ctx_heads, axis=-1).reshape(BS, H)      # lane concat

            # ---- attention output projection + residual LN -------------------
            attn_out = jnp.dot(ctx.astype(bf16), wo_ref[li],
                               preferred_element_type=f32) + bo_ref[li]
            x = _layer_norm(x + attn_out, g1_ref[li], b1_ref[li])

            # ---- feed-forward + residual LN ----------------------------------
            h1 = _gelu(jnp.dot(x.astype(bf16), w1_ref[li],
                               preferred_element_type=f32) + bf1_ref[li])
            ffn = jnp.dot(h1.astype(bf16), w2_ref[li],
                          preferred_element_type=f32) + bf2_ref[li]
            x = _layer_norm(x + ffn, g2_ref[li], b2_ref[li])

        # ---- dropout: eval-mode identity; classifier (lane-dense padded) -----
        logits = jnp.dot(x.astype(bf16), clsw_ref[...],
                         preferred_element_type=f32) + clsb_ref[...]      # (BS,LANE)

        if with_loss:
            cls_idx = jax.lax.broadcasted_iota(jnp.int32, logits.shape, 1)
            valid = cls_idx < NUM_LABELS
            lm = jnp.where(valid, logits, -1e30)                          # mask pad cols
            m = jnp.max(lm, axis=-1, keepdims=True)
            lse = jnp.log(jnp.sum(jnp.exp(lm - m), axis=-1, keepdims=True)) + m
            labels = labels_ref[...]                                      # (BS,1) int32
            picked = jnp.sum(jnp.where(cls_idx == labels, logits, 0.0),
                             axis=-1, keepdims=True)
            # mean cross-entropy -> scalar returned through SMEM
            out_ref[0, 0] = jnp.sum(lse - picked) * (1.0 / BS)
        else:
            out_ref[...] = logits

    return kernel


# ----------------------------- parameters ------------------------------------
def init_params(key):
    def normal(k, shape, scale=0.02):
        return scale * jax.random.normal(k, shape, dtype=jnp.float32)

    keys = jax.random.split(key, 4 + NUM_LAYERS)

    word_emb = normal(keys[0], (VOCAB, HIDDEN))
    pos_emb = normal(keys[1], (MAX_POS, HIDDEN))
    tok_type_emb = normal(keys[2], (TYPE_VOCAB, HIDDEN))

    # padded combined gather table: rows 0..VOCAB-1 word, next TYPE_VOCAB rows
    # token-type, rest zeros -> single one-hot MXU gather in-kernel
    gather_tab = jnp.zeros((VPAD, HIDDEN), jnp.float32)
    gather_tab = gather_tab.at[:VOCAB].set(word_emb)
    gather_tab = gather_tab.at[VOCAB:VOCAB + TYPE_VOCAB].set(tok_type_emb)

    wqkv_l, wo_l, w1_l, w2_l = [], [], [], []
    for li in range(NUM_LAYERS):
        lk = jax.random.split(keys[4 + li], 6)
        wq = normal(lk[0], (HIDDEN, HIDDEN))
        wk = normal(lk[1], (HIDDEN, HIDDEN))
        wv = normal(lk[2], (HIDDEN, HIDDEN))
        wqkv_l.append(jnp.concatenate([wq, wk, wv], axis=1))              # (H,3H)
        wo_l.append(normal(lk[3], (HIDDEN, HIDDEN)))
        w1_l.append(normal(lk[4], (HIDDEN, INTERMEDIATE)))
        w2_l.append(normal(lk[5], (INTERMEDIATE, HIDDEN)))

    zeros_h = jnp.zeros((NUM_LAYERS, 1, HIDDEN), jnp.float32)
    ones_h = jnp.ones((NUM_LAYERS, 1, HIDDEN), jnp.float32)

    cls_w = normal(keys[3], (HIDDEN, NUM_LABELS))                         # (in,out)
    cls_w_pad = jnp.zeros((HIDDEN, LANE), jnp.float32).at[:, :NUM_LABELS].set(cls_w)

    return {
        # embedding tables (gathered IN-KERNEL)
        "gather_tab": gather_tab.astype(jnp.bfloat16),                    # (VPAD,H)
        "pos_emb": pos_emb,                                               # (MAX_POS,H) f32
        "emb_ln_g": jnp.ones((1, HIDDEN), jnp.float32),
        "emb_ln_b": jnp.zeros((1, HIDDEN), jnp.float32),
        # layer-stacked encoder weights (matmul weights in bf16 for the MXU)
        "wqkv": jnp.stack(wqkv_l).astype(jnp.bfloat16),                   # (L,H,3H)
        "bqkv": jnp.zeros((NUM_LAYERS, 1, 3 * HIDDEN), jnp.float32),
        "wo": jnp.stack(wo_l).astype(jnp.bfloat16),                       # (L,H,H)
        "bo": zeros_h,
        "ln1_g": ones_h, "ln1_b": zeros_h,
        "w1": jnp.stack(w1_l).astype(jnp.bfloat16),                       # (L,H,I)
        "bf1": jnp.zeros((NUM_LAYERS, 1, INTERMEDIATE), jnp.float32),
        "w2": jnp.stack(w2_l).astype(jnp.bfloat16),                       # (L,I,H)
        "bf2": zeros_h,
        "ln2_g": ones_h, "ln2_b": zeros_h,
        # (lane-padded) classifier
        "cls_w": cls_w_pad.astype(jnp.bfloat16),                          # (H,LANE)
        "cls_b": jnp.zeros((1, LANE), jnp.float32),
    }


# ----------------------------- forward ----------------------------------------
@functools.partial(jax.jit, static_argnames=("with_loss",))
def koelectra_forward(params, input_ids, token_type_ids, attn_masks,
                      labels=None, with_loss=False):
    B, S = input_ids.shape

    # only trivial int reshapes wrapper-side; all embedding math is in-kernel
    wid = input_ids.reshape(-1, 1).astype(jnp.int32)                      # (BS,1)
    tid = token_type_ids.reshape(-1, 1).astype(jnp.int32)                 # (BS,1)
    mask = attn_masks.astype(jnp.int32)                                   # (B,S)

    weights = [params[k] for k in WEIGHT_ORDER]
    n_in = 3 + len(weights) + (1 if with_loss else 0)
    in_specs = [pl.BlockSpec(memory_space=pltpu.MemorySpace.VMEM)] * n_in

    if with_loss:
        loss = pl.pallas_call(
            make_fused_kernel(True, B, S),
            out_shape=jax.ShapeDtypeStruct((1, 1), jnp.float32),
            in_specs=in_specs,
            out_specs=pl.BlockSpec(memory_space=pltpu.MemorySpace.SMEM),
        )(wid, tid, mask, *weights, labels.reshape(-1, 1).astype(jnp.int32))
        return loss[0, 0]

    logits_pad = pl.pallas_call(
        make_fused_kernel(False, B, S),
        out_shape=jax.ShapeDtypeStruct((B * S, LANE), jnp.float32),
        in_specs=in_specs,
        out_specs=pl.BlockSpec(memory_space=pltpu.MemorySpace.VMEM),
    )(wid, tid, mask, *weights)
    # lane-dense padded slab -> real logits
    return logits_pad[:, :NUM_LABELS].reshape(B, S, NUM_LABELS)


# ----------------------------- main -------------------------------------------
if __name__ == "__main__":
    key = jax.random.PRNGKey(0)
    pkey, ikey, tkey, lkey = jax.random.split(key, 4)

    params = init_params(pkey)
    input_ids = jax.random.randint(ikey, (BATCH, SEQ), 0, VOCAB, dtype=jnp.int32)
    token_type_ids = jax.random.randint(tkey, (BATCH, SEQ), 0, TYPE_VOCAB, dtype=jnp.int32)
    attn_masks = jnp.ones((BATCH, SEQ), dtype=jnp.int32)
    labels = jax.random.randint(lkey, (BATCH, SEQ), 0, NUM_LABELS, dtype=jnp.int32)

    logits = koelectra_forward(params, input_ids, token_type_ids, attn_masks)
    jax.block_until_ready(logits)
    assert logits.shape == (BATCH, SEQ, NUM_LABELS)

    loss = koelectra_forward(params, input_ids, token_type_ids, attn_masks,
                             labels=labels, with_loss=True)
    jax.block_until_ready(loss)
    assert loss.shape == ()

    print("KERNEL_OK")
</pallas_src>

<mosaic_0001>
module attributes {stable_mosaic.version = 11 : i64} {
  func.func @kernel(%arg0: memref<16x1xi32, #tpu.memory_space<vmem>>, %arg1: memref<16x1xi32, #tpu.memory_space<vmem>>, %arg2: memref<2x8xi32, #tpu.memory_space<vmem>>, %arg3: memref<128x128xbf16, #tpu.memory_space<vmem>>, %arg4: memref<64x128xf32, #tpu.memory_space<vmem>>, %arg5: memref<1x128xf32, #tpu.memory_space<vmem>>, %arg6: memref<1x128xf32, #tpu.memory_space<vmem>>, %arg7: memref<2x128x384xbf16, #tpu.memory_space<vmem>>, %arg8: memref<2x1x384xf32, #tpu.memory_space<vmem>>, %arg9: memref<2x128x128xbf16, #tpu.memory_space<vmem>>, %arg10: memref<2x1x128xf32, #tpu.memory_space<vmem>>, %arg11: memref<2x1x128xf32, #tpu.memory_space<vmem>>, %arg12: memref<2x1x128xf32, #tpu.memory_space<vmem>>, %arg13: memref<2x128x256xbf16, #tpu.memory_space<vmem>>, %arg14: memref<2x1x256xf32, #tpu.memory_space<vmem>>, %arg15: memref<2x256x128xbf16, #tpu.memory_space<vmem>>, %arg16: memref<2x1x128xf32, #tpu.memory_space<vmem>>, %arg17: memref<2x1x128xf32, #tpu.memory_space<vmem>>, %arg18: memref<2x1x128xf32, #tpu.memory_space<vmem>>, %arg19: memref<128x128xbf16, #tpu.memory_space<vmem>>, %arg20: memref<1x128xf32, #tpu.memory_space<vmem>>, %arg21: memref<16x128xf32, #tpu.memory_space<vmem>>) attributes {dimension_semantics = [], scalar_prefetch = 0 : i64, scratch_operands = 0 : i64, tpu.core_type = #tpu.core_type<tc>} {
    %0 = tpu.iota {dimensions = array<i32: 1>} : vector<16x128xi32>
    %c0 = arith.constant 0 : index
    %c0_0 = arith.constant 0 : index
    %1 = vector.load %arg0[%c0, %c0_0] : memref<16x1xi32, #tpu.memory_space<vmem>>, vector<16x1xi32>
    %2 = vector.broadcast %1 : vector<16x1xi32> to vector<16x128xi32>
    %3 = arith.cmpi eq, %0, %2 : vector<16x128xi32>
    %cst = arith.constant 1.000000e+00 : f32
    %cst_1 = arith.constant 0.000000e+00 : f32
    %4 = vector.broadcast %cst : f32 to vector<16x128xf32>
    %5 = vector.broadcast %cst_1 : f32 to vector<16x128xf32>
    %6 = arith.select %3, %4, %5 : vector<16x128xi1>, vector<16x128xf32>
    %c0_2 = arith.constant 0 : index
    %c0_3 = arith.constant 0 : index
    %7 = vector.load %arg1[%c0_2, %c0_3] : memref<16x1xi32, #tpu.memory_space<vmem>>, vector<16x1xi32>
    %c120_i32 = arith.constant 120 : i32
    %8 = vector.broadcast %c120_i32 : i32 to vector<16x1xi32>
    %9 = arith.addi %7, %8 : vector<16x1xi32>
    %10 = vector.broadcast %9 : vector<16x1xi32> to vector<16x128xi32>
    %11 = arith.cmpi eq, %0, %10 : vector<16x128xi32>
    %cst_4 = arith.constant 1.000000e+00 : f32
    %cst_5 = arith.constant 0.000000e+00 : f32
    %12 = vector.broadcast %cst_4 : f32 to vector<16x128xf32>
    %13 = vector.broadcast %cst_5 : f32 to vector<16x128xf32>
    %14 = arith.select %11, %12, %13 : vector<16x128xi1>, vector<16x128xf32>
    %15 = arith.addf %6, %14 : vector<16x128xf32>
    %16 = arith.truncf %15 : vector<16x128xf32> to vector<16x128xbf16>
    %c0_6 = arith.constant 0 : index
    %c0_7 = arith.constant 0 : index
    %17 = vector.load %arg3[%c0_6, %c0_7] : memref<128x128xbf16, #tpu.memory_space<vmem>>, vector<128x128xbf16>
    %cst_8 = arith.constant dense<0.000000e+00> : vector<16x128xf32>
    %18 = tpu.matmul %16, %17, %cst_8 {dimension_numbers = #tpu.dot_dimension_numbers<[1], [0], [0], [1], [0, 0, 1, 1], [], []>} : vector<16x128xbf16>, vector<128x128xbf16>, vector<16x128xf32> -> vector<16x128xf32>
    %c0_9 = arith.constant 0 : index
    %c0_10 = arith.constant 0 : index
    %19 = vector.load %arg4[%c0_9, %c0_10] : memref<64x128xf32, #tpu.memory_space<vmem>>, vector<8x128xf32>
    %20 = tpu.concatenate %19, %19 in 0 : vector<8x128xf32>, vector<8x128xf32> -> vector<16x128xf32>
    %21 = arith.addf %18, %20 : vector<16x128xf32>
    %c0_11 = arith.constant 0 : index
    %c0_12 = arith.constant 0 : index
    %22 = vector.load %arg5[%c0_11, %c0_12] : memref<1x128xf32, #tpu.memory_space<vmem>>, vector<1x128xf32>
    %c0_13 = arith.constant 0 : index
    %c0_14 = arith.constant 0 : index
    %23 = vector.load %arg6[%c0_13, %c0_14] : memref<1x128xf32, #tpu.memory_space<vmem>>, vector<1x128xf32>
    %cst_15 = arith.constant dense<0.000000e+00> : vector<16xf32>
    %24 = vector.multi_reduction <add>, %21, %cst_15 [1] : vector<16x128xf32> to vector<16xf32>
    %25 = vector.shape_cast %24 : vector<16xf32> to vector<16x1xf32>
    %cst_16 = arith.constant 1.280000e+02 : f32
    %26 = vector.broadcast %cst_16 : f32 to vector<16x1xf32>
    %27 = arith.divf %25, %26 : vector<16x1xf32>
    %28 = vector.broadcast %27 : vector<16x1xf32> to vector<16x128xf32>
    %29 = arith.subf %21, %28 : vector<16x128xf32>
    %30 = arith.mulf %29, %29 : vector<16x128xf32>
    %cst_17 = arith.constant dense<0.000000e+00> : vector<16xf32>
    %31 = vector.multi_reduction <add>, %30, %cst_17 [1] : vector<16x128xf32> to vector<16xf32>
    %32 = vector.shape_cast %31 : vector<16xf32> to vector<16x1xf32>
    %cst_18 = arith.constant 1.280000e+02 : f32
    %33 = vector.broadcast %cst_18 : f32 to vector<16x1xf32>
    %34 = arith.divf %32, %33 : vector<16x1xf32>
    %35 = vector.broadcast %27 : vector<16x1xf32> to vector<16x128xf32>
    %36 = arith.subf %21, %35 : vector<16x128xf32>
    %cst_19 = arith.constant 9.99999996E-13 : f32
    %37 = vector.broadcast %cst_19 : f32 to vector<16x1xf32>
    %38 = arith.addf %34, %37 : vector<16x1xf32>
    %39 = math.rsqrt %38 : vector<16x1xf32>
    %40 = vector.broadcast %39 : vector<16x1xf32> to vector<16x128xf32>
    %41 = arith.mulf %36, %40 : vector<16x128xf32>
    %42 = vector.broadcast %22 : vector<1x128xf32> to vector<16x128xf32>
    %43 = arith.mulf %41, %42 : vector<16x128xf32>
    %44 = vector.broadcast %23 : vector<1x128xf32> to vector<16x128xf32>
    %45 = arith.addf %43, %44 : vector<16x128xf32>
    %c0_20 = arith.constant 0 : index
    %c0_21 = arith.constant 0 : index
    %46 = vector.load %arg2[%c0_20, %c0_21] : memref<2x8xi32, #tpu.memory_space<vmem>>, vector<2x8xi32>
    %47 = arith.sitofp %46 : vector<2x8xi32> to vector<2x8xf32>
    %cst_22 = arith.constant 1.000000e+00 : f32
    %48 = vector.broadcast %cst_22 : f32 to vector<2x8xf32>
    %49 = arith.subf %48, %47 : vector<2x8xf32>
    %cst_23 = arith.constant -1.000000e+04 : f32
    %50 = vector.broadcast %cst_23 : f32 to vector<2x8xf32>
    %51 = arith.mulf %49, %50 : vector<2x8xf32>
    %52 = vector.shape_cast %51 : vector<2x8xf32> to vector<2x1x8xf32>
    %53 = vector.shape_cast %52 : vector<2x1x8xf32> to vector<2x1x8xf32>
    %54 = vector.broadcast %53 : vector<2x1x8xf32> to vector<2x8x8xf32>
    %55 = arith.truncf %45 : vector<16x128xf32> to vector<16x128xbf16>
    %c0_24 = arith.constant 0 : index
    %c0_25 = arith.constant 0 : index
    %c0_26 = arith.constant 0 : index
    %56 = vector.load %arg7[%c0_24, %c0_25, %c0_26] : memref<2x128x384xbf16, #tpu.memory_space<vmem>>, vector<1x128x384xbf16>
    %57 = vector.shape_cast %56 : vector<1x128x384xbf16> to vector<128x384xbf16>
    %cst_27 = arith.constant dense<0.000000e+00> : vector<16x384xf32>
    %58 = tpu.matmul %55, %57, %cst_27 {dimension_numbers = #tpu.dot_dimension_numbers<[1], [0], [0], [1], [0, 0, 1, 1], [], []>} : vector<16x128xbf16>, vector<128x384xbf16>, vector<16x384xf32> -> vector<16x384xf32>
    %c0_28 = arith.constant 0 : index
    %c0_29 = arith.constant 0 : index
    %c0_30 = arith.constant 0 : index
    %59 = vector.load %arg8[%c0_28, %c0_29, %c0_30] : memref<2x1x384xf32, #tpu.memory_space<vmem>>, vector<1x1x384xf32>
    %60 = vector.shape_cast %59 : vector<1x1x384xf32> to vector<1x384xf32>
    %61 = vector.broadcast %60 : vector<1x384xf32> to vector<16x384xf32>
    %62 = arith.addf %58, %61 : vector<16x384xf32>
    %63 = vector.extract_strided_slice %62 {offsets = [0, 0], sizes = [16, 128], strides = [1, 1]} : vector<16x384xf32> to vector<16x128xf32>
    %64 = vector.shape_cast %63 : vector<16x128xf32> to vector<2x8x128xf32>
    %65 = vector.extract_strided_slice %62 {offsets = [0, 128], sizes = [16, 128], strides = [1, 1]} : vector<16x384xf32> to vector<16x128xf32>
    %66 = vector.shape_cast %65 : vector<16x128xf32> to vector<2x8x128xf32>
    %67 = vector.extract_strided_slice %62 {offsets = [0, 256], sizes = [16, 128], strides = [1, 1]} : vector<16x384xf32> to vector<16x128xf32>
    %68 = vector.shape_cast %67 : vector<16x128xf32> to vector<2x8x128xf32>
    %69 = vector.extract_strided_slice %64 {offsets = [0, 0, 0], sizes = [2, 8, 64], strides = [1, 1, 1]} : vector<2x8x128xf32> to vector<2x8x64xf32>
    %70 = arith.truncf %69 : vector<2x8x64xf32> to vector<2x8x64xbf16>
    %71 = vector.extract_strided_slice %66 {offsets = [0, 0, 0], sizes = [2, 8, 64], strides = [1, 1, 1]} : vector<2x8x128xf32> to vector<2x8x64xf32>
    %72 = arith.truncf %71 : vector<2x8x64xf32> to vector<2x8x64xbf16>
    %73 = vector.extract_strided_slice %68 {offsets = [0, 0, 0], sizes = [2, 8, 64], strides = [1, 1, 1]} : vector<2x8x128xf32> to vector<2x8x64xf32>
    %74 = arith.truncf %73 : vector<2x8x64xf32> to vector<2x8x64xbf16>
    "tpu.trace_start"() <{level = 10 : i32, message = "bqd,bkd->bqk"}> : () -> ()
    %cst_31 = arith.constant dense<0.000000e+00> : vector<2x8x8xf32>
    %75 = tpu.matmul %70, %72, %cst_31 {dimension_numbers = #tpu.dot_dimension_numbers<[2], [2], [1], [1], [0, 0, 0, 1, 1, 1], [0], [0]>} : vector<2x8x64xbf16>, vector<2x8x64xbf16>, vector<2x8x8xf32> -> vector<2x8x8xf32>
    "tpu.trace_stop"() : () -> ()
    %cst_32 = arith.constant 1.250000e-01 : f32
    %76 = vector.broadcast %cst_32 : f32 to vector<2x8x8xf32>
    %77 = arith.mulf %75, %76 : vector<2x8x8xf32>
    %78 = arith.addf %77, %54 : vector<2x8x8xf32>
    %cst_33 = arith.constant dense<0xFF800000> : vector<2x8xf32>
    %79 = vector.multi_reduction <maximumf>, %78, %cst_33 [2] : vector<2x8x8xf32> to vector<2x8xf32>
    %80 = vector.shape_cast %79 : vector<2x8xf32> to vector<2x8x1xf32>
    %81 = vector.broadcast %80 : vector<2x8x1xf32> to vector<2x8x8xf32>
    %82 = arith.subf %78, %81 : vector<2x8x8xf32>
    %83 = math.exp %82 : vector<2x8x8xf32>
    %cst_34 = arith.constant dense<0.000000e+00> : vector<2x8xf32>
    %84 = vector.multi_reduction <add>, %83, %cst_34 [2] : vector<2x8x8xf32> to vector<2x8xf32>
    %85 = vector.shape_cast %84 : vector<2x8xf32> to vector<2x8x1xf32>
    %86 = tpu.reciprocal %85 {approx = true} : vector<2x8x1xf32> -> vector<2x8x1xf32>
    %87 = vector.broadcast %86 : vector<2x8x1xf32> to vector<2x8x8xf32>
    %88 = arith.mulf %83, %87 : vector<2x8x8xf32>
    %89 = arith.truncf %88 : vector<2x8x8xf32> to vector<2x8x8xbf16>
    "tpu.trace_start"() <{level = 10 : i32, message = "bqk,bkd->bqd"}> : () -> ()
    %cst_35 = arith.constant dense<0.000000e+00> : vector<2x8x64xf32>
    %90 = tpu.matmul %89, %74, %cst_35 {dimension_numbers = #tpu.dot_dimension_numbers<[2], [1], [1], [2], [0, 0, 0, 1, 1, 2], [0], [0]>} : vector<2x8x8xbf16>, vector<2x8x64xbf16>, vector<2x8x64xf32> -> vector<2x8x64xf32>
    "tpu.trace_stop"() : () -> ()
    %91 = vector.extract_strided_slice %64 {offsets = [0, 0, 64], sizes = [2, 8, 64], strides = [1, 1, 1]} : vector<2x8x128xf32> to vector<2x8x64xf32>
    %92 = arith.truncf %91 : vector<2x8x64xf32> to vector<2x8x64xbf16>
    %93 = vector.extract_strided_slice %66 {offsets = [0, 0, 64], sizes = [2, 8, 64], strides = [1, 1, 1]} : vector<2x8x128xf32> to vector<2x8x64xf32>
    %94 = arith.truncf %93 : vector<2x8x64xf32> to vector<2x8x64xbf16>
    %95 = vector.extract_strided_slice %68 {offsets = [0, 0, 64], sizes = [2, 8, 64], strides = [1, 1, 1]} : vector<2x8x128xf32> to vector<2x8x64xf32>
    %96 = arith.truncf %95 : vector<2x8x64xf32> to vector<2x8x64xbf16>
    "tpu.trace_start"() <{level = 10 : i32, message = "bqd,bkd->bqk"}> : () -> ()
    %cst_36 = arith.constant dense<0.000000e+00> : vector<2x8x8xf32>
    %97 = tpu.matmul %92, %94, %cst_36 {dimension_numbers = #tpu.dot_dimension_numbers<[2], [2], [1], [1], [0, 0, 0, 1, 1, 1], [0], [0]>} : vector<2x8x64xbf16>, vector<2x8x64xbf16>, vector<2x8x8xf32> -> vector<2x8x8xf32>
    "tpu.trace_stop"() : () -> ()
    %cst_37 = arith.constant 1.250000e-01 : f32
    %98 = vector.broadcast %cst_37 : f32 to vector<2x8x8xf32>
    %99 = arith.mulf %97, %98 : vector<2x8x8xf32>
    %100 = arith.addf %99, %54 : vector<2x8x8xf32>
    %cst_38 = arith.constant dense<0xFF800000> : vector<2x8xf32>
    %101 = vector.multi_reduction <maximumf>, %100, %cst_38 [2] : vector<2x8x8xf32> to vector<2x8xf32>
    %102 = vector.shape_cast %101 : vector<2x8xf32> to vector<2x8x1xf32>
    %103 = vector.broadcast %102 : vector<2x8x1xf32> to vector<2x8x8xf32>
    %104 = arith.subf %100, %103 : vector<2x8x8xf32>
    %105 = math.exp %104 : vector<2x8x8xf32>
    %cst_39 = arith.constant dense<0.000000e+00> : vector<2x8xf32>
    %106 = vector.multi_reduction <add>, %105, %cst_39 [2] : vector<2x8x8xf32> to vector<2x8xf32>
    %107 = vector.shape_cast %106 : vector<2x8xf32> to vector<2x8x1xf32>
    %108 = tpu.reciprocal %107 {approx = true} : vector<2x8x1xf32> -> vector<2x8x1xf32>
    %109 = vector.broadcast %108 : vector<2x8x1xf32> to vector<2x8x8xf32>
    %110 = arith.mulf %105, %109 : vector<2x8x8xf32>
    %111 = arith.truncf %110 : vector<2x8x8xf32> to vector<2x8x8xbf16>
    "tpu.trace_start"() <{level = 10 : i32, message = "bqk,bkd->bqd"}> : () -> ()
    %cst_40 = arith.constant dense<0.000000e+00> : vector<2x8x64xf32>
    %112 = tpu.matmul %111, %96, %cst_40 {dimension_numbers = #tpu.dot_dimension_numbers<[2], [1], [1], [2], [0, 0, 0, 1, 1, 2], [0], [0]>} : vector<2x8x8xbf16>, vector<2x8x64xbf16>, vector<2x8x64xf32> -> vector<2x8x64xf32>
    "tpu.trace_stop"() : () -> ()
    %113 = tpu.concatenate %90, %112 in 2 : vector<2x8x64xf32>, vector<2x8x64xf32> -> vector<2x8x128xf32>
    %114 = vector.shape_cast %113 : vector<2x8x128xf32> to vector<16x128xf32>
    %115 = arith.truncf %114 : vector<16x128xf32> to vector<16x128xbf16>
    %c0_41 = arith.constant 0 : index
    %c0_42 = arith.constant 0 : index
    %c0_43 = arith.constant 0 : index
    %116 = vector.load %arg9[%c0_41, %c0_42, %c0_43] : memref<2x128x128xbf16, #tpu.memory_space<vmem>>, vector<1x128x128xbf16>
    %117 = vector.shape_cast %116 : vector<1x128x128xbf16> to vector<128x128xbf16>
    %cst_44 = arith.constant dense<0.000000e+00> : vector<16x128xf32>
    %118 = tpu.matmul %115, %117, %cst_44 {dimension_numbers = #tpu.dot_dimension_numbers<[1], [0], [0], [1], [0, 0, 1, 1], [], []>} : vector<16x128xbf16>, vector<128x128xbf16>, vector<16x128xf32> -> vector<16x128xf32>
    %c0_45 = arith.constant 0 : index
    %c0_46 = arith.constant 0 : index
    %c0_47 = arith.constant 0 : index
    %119 = vector.load %arg10[%c0_45, %c0_46, %c0_47] : memref<2x1x128xf32, #tpu.memory_space<vmem>>, vector<1x1x128xf32>
    %120 = vector.shape_cast %119 : vector<1x1x128xf32> to vector<1x128xf32>
    %121 = vector.broadcast %120 : vector<1x128xf32> to vector<16x128xf32>
    %122 = arith.addf %118, %121 : vector<16x128xf32>
    %123 = arith.addf %45, %122 : vector<16x128xf32>
    %c0_48 = arith.constant 0 : index
    %c0_49 = arith.constant 0 : index
    %c0_50 = arith.constant 0 : index
    %124 = vector.load %arg11[%c0_48, %c0_49, %c0_50] : memref<2x1x128xf32, #tpu.memory_space<vmem>>, vector<1x1x128xf32>
    %125 = vector.shape_cast %124 : vector<1x1x128xf32> to vector<1x128xf32>
    %c0_51 = arith.constant 0 : index
    %c0_52 = arith.constant 0 : index
    %c0_53 = arith.constant 0 : index
    %126 = vector.load %arg12[%c0_51, %c0_52, %c0_53] : memref<2x1x128xf32, #tpu.memory_space<vmem>>, vector<1x1x128xf32>
    %127 = vector.shape_cast %126 : vector<1x1x128xf32> to vector<1x128xf32>
    %cst_54 = arith.constant dense<0.000000e+00> : vector<16xf32>
    %128 = vector.multi_reduction <add>, %123, %cst_54 [1] : vector<16x128xf32> to vector<16xf32>
    %129 = vector.shape_cast %128 : vector<16xf32> to vector<16x1xf32>
    %cst_55 = arith.constant 1.280000e+02 : f32
    %130 = vector.broadcast %cst_55 : f32 to vector<16x1xf32>
    %131 = arith.divf %129, %130 : vector<16x1xf32>
    %132 = vector.broadcast %131 : vector<16x1xf32> to vector<16x128xf32>
    %133 = arith.subf %123, %132 : vector<16x128xf32>
    %134 = arith.mulf %133, %133 : vector<16x128xf32>
    %cst_56 = arith.constant dense<0.000000e+00> : vector<16xf32>
    %135 = vector.multi_reduction <add>, %134, %cst_56 [1] : vector<16x128xf32> to vector<16xf32>
    %136 = vector.shape_cast %135 : vector<16xf32> to vector<16x1xf32>
    %cst_57 = arith.constant 1.280000e+02 : f32
    %137 = vector.broadcast %cst_57 : f32 to vector<16x1xf32>
    %138 = arith.divf %136, %137 : vector<16x1xf32>
    %139 = vector.broadcast %131 : vector<16x1xf32> to vector<16x128xf32>
    %140 = arith.subf %123, %139 : vector<16x128xf32>
    %cst_58 = arith.constant 9.99999996E-13 : f32
    %141 = vector.broadcast %cst_58 : f32 to vector<16x1xf32>
    %142 = arith.addf %138, %141 : vector<16x1xf32>
    %143 = math.rsqrt %142 : vector<16x1xf32>
    %144 = vector.broadcast %143 : vector<16x1xf32> to vector<16x128xf32>
    %145 = arith.mulf %140, %144 : vector<16x128xf32>
    %146 = vector.broadcast %125 : vector<1x128xf32> to vector<16x128xf32>
    %147 = arith.mulf %145, %146 : vector<16x128xf32>
    %148 = vector.broadcast %127 : vector<1x128xf32> to vector<16x128xf32>
    %149 = arith.addf %147, %148 : vector<16x128xf32>
    %150 = arith.truncf %149 : vector<16x128xf32> to vector<16x128xbf16>
    %c0_59 = arith.constant 0 : index
    %c0_60 = arith.constant 0 : index
    %c0_61 = arith.constant 0 : index
    %151 = vector.load %arg13[%c0_59, %c0_60, %c0_61] : memref<2x128x256xbf16, #tpu.memory_space<vmem>>, vector<1x128x256xbf16>
    %152 = vector.shape_cast %151 : vector<1x128x256xbf16> to vector<128x256xbf16>
    %cst_62 = arith.constant dense<0.000000e+00> : vector<16x256xf32>
    %153 = tpu.matmul %150, %152, %cst_62 {dimension_numbers = #tpu.dot_dimension_numbers<[1], [0], [0], [1], [0, 0, 1, 1], [], []>} : vector<16x128xbf16>, vector<128x256xbf16>, vector<16x256xf32> -> vector<16x256xf32>
    %c0_63 = arith.constant 0 : index
    %c0_64 = arith.constant 0 : index
    %c0_65 = arith.constant 0 : index
    %154 = vector.load %arg14[%c0_63, %c0_64, %c0_65] : memref<2x1x256xf32, #tpu.memory_space<vmem>>, vector<1x1x256xf32>
    %155 = vector.shape_cast %154 : vector<1x1x256xf32> to vector<1x256xf32>
    %156 = vector.broadcast %155 : vector<1x256xf32> to vector<16x256xf32>
    %157 = arith.addf %153, %156 : vector<16x256xf32>
    %158 = arith.mulf %157, %157 : vector<16x256xf32>
    %159 = arith.mulf %157, %158 : vector<16x256xf32>
    %cst_66 = arith.constant 4.471500e-02 : f32
    %160 = vector.broadcast %cst_66 : f32 to vector<16x256xf32>
    %161 = arith.mulf %160, %159 : vector<16x256xf32>
    %162 = arith.addf %157, %161 : vector<16x256xf32>
    %cst_67 = arith.constant 0.797884583 : f32
    %163 = vector.broadcast %cst_67 : f32 to vector<16x256xf32>
    %164 = arith.mulf %163, %162 : vector<16x256xf32>
    %165 = math.tanh %164 : vector<16x256xf32>
    %cst_68 = arith.constant 1.000000e+00 : f32
    %166 = vector.broadcast %cst_68 : f32 to vector<16x256xf32>
    %167 = arith.addf %166, %165 : vector<16x256xf32>
    %cst_69 = arith.constant 5.000000e-01 : f32
    %168 = vector.broadcast %cst_69 : f32 to vector<16x256xf32>
    %169 = arith.mulf %168, %167 : vector<16x256xf32>
    %170 = arith.mulf %157, %169 : vector<16x256xf32>
    %171 = arith.truncf %170 : vector<16x256xf32> to vector<16x256xbf16>
    %c0_70 = arith.constant 0 : index
    %c0_71 = arith.constant 0 : index
    %c0_72 = arith.constant 0 : index
    %172 = vector.load %arg15[%c0_70, %c0_71, %c0_72] : memref<2x256x128xbf16, #tpu.memory_space<vmem>>, vector<1x256x128xbf16>
    %173 = vector.shape_cast %172 : vector<1x256x128xbf16> to vector<256x128xbf16>
    %cst_73 = arith.constant dense<0.000000e+00> : vector<16x128xf32>
    %174 = tpu.matmul %171, %173, %cst_73 {dimension_numbers = #tpu.dot_dimension_numbers<[1], [0], [0], [1], [0, 0, 1, 1], [], []>} : vector<16x256xbf16>, vector<256x128xbf16>, vector<16x128xf32> -> vector<16x128xf32>
    %c0_74 = arith.constant 0 : index
    %c0_75 = arith.constant 0 : index
    %c0_76 = arith.constant 0 : index
    %175 = vector.load %arg16[%c0_74, %c0_75, %c0_76] : memref<2x1x128xf32, #tpu.memory_space<vmem>>, vector<1x1x128xf32>
    %176 = vector.shape_cast %175 : vector<1x1x128xf32> to vector<1x128xf32>
    %177 = vector.broadcast %176 : vector<1x128xf32> to vector<16x128xf32>
    %178 = arith.addf %174, %177 : vector<16x128xf32>
    %179 = arith.addf %149, %178 : vector<16x128xf32>
    %c0_77 = arith.constant 0 : index
    %c0_78 = arith.constant 0 : index
    %c0_79 = arith.constant 0 : index
    %180 = vector.load %arg17[%c0_77, %c0_78, %c0_79] : memref<2x1x128xf32, #tpu.memory_space<vmem>>, vector<1x1x128xf32>
    %181 = vector.shape_cast %180 : vector<1x1x128xf32> to vector<1x128xf32>
    %c0_80 = arith.constant 0 : index
    %c0_81 = arith.constant 0 : index
    %c0_82 = arith.constant 0 : index
    %182 = vector.load %arg18[%c0_80, %c0_81, %c0_82] : memref<2x1x128xf32, #tpu.memory_space<vmem>>, vector<1x1x128xf32>
    %183 = vector.shape_cast %182 : vector<1x1x128xf32> to vector<1x128xf32>
    %cst_83 = arith.constant dense<0.000000e+00> : vector<16xf32>
    %184 = vector.multi_reduction <add>, %179, %cst_83 [1] : vector<16x128xf32> to vector<16xf32>
    %185 = vector.shape_cast %184 : vector<16xf32> to vector<16x1xf32>
    %cst_84 = arith.constant 1.280000e+02 : f32
    %186 = vector.broadcast %cst_84 : f32 to vector<16x1xf32>
    %187 = arith.divf %185, %186 : vector<16x1xf32>
    %188 = vector.broadcast %187 : vector<16x1xf32> to vector<16x128xf32>
    %189 = arith.subf %179, %188 : vector<16x128xf32>
    %190 = arith.mulf %189, %189 : vector<16x128xf32>
    %cst_85 = arith.constant dense<0.000000e+00> : vector<16xf32>
    %191 = vector.multi_reduction <add>, %190, %cst_85 [1] : vector<16x128xf32> to vector<16xf32>
    %192 = vector.shape_cast %191 : vector<16xf32> to vector<16x1xf32>
    %cst_86 = arith.constant 1.280000e+02 : f32
    %193 = vector.broadcast %cst_86 : f32 to vector<16x1xf32>
    %194 = arith.divf %192, %193 : vector<16x1xf32>
    %195 = vector.broadcast %187 : vector<16x1xf32> to vector<16x128xf32>
    %196 = arith.subf %179, %195 : vector<16x128xf32>
    %cst_87 = arith.constant 9.99999996E-13 : f32
    %197 = vector.broadcast %cst_87 : f32 to vector<16x1xf32>
    %198 = arith.addf %194, %197 : vector<16x1xf32>
    %199 = math.rsqrt %198 : vector<16x1xf32>
    %200 = vector.broadcast %199 : vector<16x1xf32> to vector<16x128xf32>
    %201 = arith.mulf %196, %200 : vector<16x128xf32>
    %202 = vector.broadcast %181 : vector<1x128xf32> to vector<16x128xf32>
    %203 = arith.mulf %201, %202 : vector<16x128xf32>
    %204 = vector.broadcast %183 : vector<1x128xf32> to vector<16x128xf32>
    %205 = arith.addf %203, %204 : vector<16x128xf32>
    %206 = arith.truncf %205 : vector<16x128xf32> to vector<16x128xbf16>
    %c1 = arith.constant 1 : index
    %c0_88 = arith.constant 0 : index
    %c0_89 = arith.constant 0 : index
    %207 = vector.load %arg7[%c1, %c0_88, %c0_89] : memref<2x128x384xbf16, #tpu.memory_space<vmem>>, vector<1x128x384xbf16>
    %208 = vector.shape_cast %207 : vector<1x128x384xbf16> to vector<128x384xbf16>
    %cst_90 = arith.constant dense<0.000000e+00> : vector<16x384xf32>
    %209 = tpu.matmul %206, %208, %cst_90 {dimension_numbers = #tpu.dot_dimension_numbers<[1], [0], [0], [1], [0, 0, 1, 1], [], []>} : vector<16x128xbf16>, vector<128x384xbf16>, vector<16x384xf32> -> vector<16x384xf32>
    %c1_91 = arith.constant 1 : index
    %c0_92 = arith.constant 0 : index
    %c0_93 = arith.constant 0 : index
    %210 = vector.load %arg8[%c1_91, %c0_92, %c0_93] : memref<2x1x384xf32, #tpu.memory_space<vmem>>, vector<1x1x384xf32>
    %211 = vector.shape_cast %210 : vector<1x1x384xf32> to vector<1x384xf32>
    %212 = vector.broadcast %211 : vector<1x384xf32> to vector<16x384xf32>
    %213 = arith.addf %209, %212 : vector<16x384xf32>
    %214 = vector.extract_strided_slice %213 {offsets = [0, 0], sizes = [16, 128], strides = [1, 1]} : vector<16x384xf32> to vector<16x128xf32>
    %215 = vector.shape_cast %214 : vector<16x128xf32> to vector<2x8x128xf32>
    %216 = vector.extract_strided_slice %213 {offsets = [0, 128], sizes = [16, 128], strides = [1, 1]} : vector<16x384xf32> to vector<16x128xf32>
    %217 = vector.shape_cast %216 : vector<16x128xf32> to vector<2x8x128xf32>
    %218 = vector.extract_strided_slice %213 {offsets = [0, 256], sizes = [16, 128], strides = [1, 1]} : vector<16x384xf32> to vector<16x128xf32>
    %219 = vector.shape_cast %218 : vector<16x128xf32> to vector<2x8x128xf32>
    %220 = vector.extract_strided_slice %215 {offsets = [0, 0, 0], sizes = [2, 8, 64], strides = [1, 1, 1]} : vector<2x8x128xf32> to vector<2x8x64xf32>
    %221 = arith.truncf %220 : vector<2x8x64xf32> to vector<2x8x64xbf16>
    %222 = vector.extract_strided_slice %217 {offsets = [0, 0, 0], sizes = [2, 8, 64], strides = [1, 1, 1]} : vector<2x8x128xf32> to vector<2x8x64xf32>
    %223 = arith.truncf %222 : vector<2x8x64xf32> to vector<2x8x64xbf16>
    %224 = vector.extract_strided_slice %219 {offsets = [0, 0, 0], sizes = [2, 8, 64], strides = [1, 1, 1]} : vector<2x8x128xf32> to vector<2x8x64xf32>
    %225 = arith.truncf %224 : vector<2x8x64xf32> to vector<2x8x64xbf16>
    "tpu.trace_start"() <{level = 10 : i32, message = "bqd,bkd->bqk"}> : () -> ()
    %cst_94 = arith.constant dense<0.000000e+00> : vector<2x8x8xf32>
    %226 = tpu.matmul %221, %223, %cst_94 {dimension_numbers = #tpu.dot_dimension_numbers<[2], [2], [1], [1], [0, 0, 0, 1, 1, 1], [0], [0]>} : vector<2x8x64xbf16>, vector<2x8x64xbf16>, vector<2x8x8xf32> -> vector<2x8x8xf32>
    "tpu.trace_stop"() : () -> ()
    %cst_95 = arith.constant 1.250000e-01 : f32
    %227 = vector.broadcast %cst_95 : f32 to vector<2x8x8xf32>
    %228 = arith.mulf %226, %227 : vector<2x8x8xf32>
    %229 = arith.addf %228, %54 : vector<2x8x8xf32>
    %cst_96 = arith.constant dense<0xFF800000> : vector<2x8xf32>
    %230 = vector.multi_reduction <maximumf>, %229, %cst_96 [2] : vector<2x8x8xf32> to vector<2x8xf32>
    %231 = vector.shape_cast %230 : vector<2x8xf32> to vector<2x8x1xf32>
    %232 = vector.broadcast %231 : vector<2x8x1xf32> to vector<2x8x8xf32>
    %233 = arith.subf %229, %232 : vector<2x8x8xf32>
    %234 = math.exp %233 : vector<2x8x8xf32>
    %cst_97 = arith.constant dense<0.000000e+00> : vector<2x8xf32>
    %235 = vector.multi_reduction <add>, %234, %cst_97 [2] : vector<2x8x8xf32> to vector<2x8xf32>
    %236 = vector.shape_cast %235 : vector<2x8xf32> to vector<2x8x1xf32>
    %237 = tpu.reciprocal %236 {approx = true} : vector<2x8x1xf32> -> vector<2x8x1xf32>
    %238 = vector.broadcast %237 : vector<2x8x1xf32> to vector<2x8x8xf32>
    %239 = arith.mulf %234, %238 : vector<2x8x8xf32>
    %240 = arith.truncf %239 : vector<2x8x8xf32> to vector<2x8x8xbf16>
    "tpu.trace_start"() <{level = 10 : i32, message = "bqk,bkd->bqd"}> : () -> ()
    %cst_98 = arith.constant dense<0.000000e+00> : vector<2x8x64xf32>
    %241 = tpu.matmul %240, %225, %cst_98 {dimension_numbers = #tpu.dot_dimension_numbers<[2], [1], [1], [2], [0, 0, 0, 1, 1, 2], [0], [0]>} : vector<2x8x8xbf16>, vector<2x8x64xbf16>, vector<2x8x64xf32> -> vector<2x8x64xf32>
    "tpu.trace_stop"() : () -> ()
    %242 = vector.extract_strided_slice %215 {offsets = [0, 0, 64], sizes = [2, 8, 64], strides = [1, 1, 1]} : vector<2x8x128xf32> to vector<2x8x64xf32>
    %243 = arith.truncf %242 : vector<2x8x64xf32> to vector<2x8x64xbf16>
    %244 = vector.extract_strided_slice %217 {offsets = [0, 0, 64], sizes = [2, 8, 64], strides = [1, 1, 1]} : vector<2x8x128xf32> to vector<2x8x64xf32>
    %245 = arith.truncf %244 : vector<2x8x64xf32> to vector<2x8x64xbf16>
    %246 = vector.extract_strided_slice %219 {offsets = [0, 0, 64], sizes = [2, 8, 64], strides = [1, 1, 1]} : vector<2x8x128xf32> to vector<2x8x64xf32>
    %247 = arith.truncf %246 : vector<2x8x64xf32> to vector<2x8x64xbf16>
    "tpu.trace_start"() <{level = 10 : i32, message = "bqd,bkd->bqk"}> : () -> ()
    %cst_99 = arith.constant dense<0.000000e+00> : vector<2x8x8xf32>
    %248 = tpu.matmul %243, %245, %cst_99 {dimension_numbers = #tpu.dot_dimension_numbers<[2], [2], [1], [1], [0, 0, 0, 1, 1, 1], [0], [0]>} : vector<2x8x64xbf16>, vector<2x8x64xbf16>, vector<2x8x8xf32> -> vector<2x8x8xf32>
    "tpu.trace_stop"() : () -> ()
    %cst_100 = arith.constant 1.250000e-01 : f32
    %249 = vector.broadcast %cst_100 : f32 to vector<2x8x8xf32>
    %250 = arith.mulf %248, %249 : vector<2x8x8xf32>
    %251 = arith.addf %250, %54 : vector<2x8x8xf32>
    %cst_101 = arith.constant dense<0xFF800000> : vector<2x8xf32>
    %252 = vector.multi_reduction <maximumf>, %251, %cst_101 [2] : vector<2x8x8xf32> to vector<2x8xf32>
    %253 = vector.shape_cast %252 : vector<2x8xf32> to vector<2x8x1xf32>
    %254 = vector.broadcast %253 : vector<2x8x1xf32> to vector<2x8x8xf32>
    %255 = arith.subf %251, %254 : vector<2x8x8xf32>
    %256 = math.exp %255 : vector<2x8x8xf32>
    %cst_102 = arith.constant dense<0.000000e+00> : vector<2x8xf32>
    %257 = vector.multi_reduction <add>, %256, %cst_102 [2] : vector<2x8x8xf32> to vector<2x8xf32>
    %258 = vector.shape_cast %257 : vector<2x8xf32> to vector<2x8x1xf32>
    %259 = tpu.reciprocal %258 {approx = true} : vector<2x8x1xf32> -> vector<2x8x1xf32>
    %260 = vector.broadcast %259 : vector<2x8x1xf32> to vector<2x8x8xf32>
    %261 = arith.mulf %256, %260 : vector<2x8x8xf32>
    %262 = arith.truncf %261 : vector<2x8x8xf32> to vector<2x8x8xbf16>
    "tpu.trace_start"() <{level = 10 : i32, message = "bqk,bkd->bqd"}> : () -> ()
    %cst_103 = arith.constant dense<0.000000e+00> : vector<2x8x64xf32>
    %263 = tpu.matmul %262, %247, %cst_103 {dimension_numbers = #tpu.dot_dimension_numbers<[2], [1], [1], [2], [0, 0, 0, 1, 1, 2], [0], [0]>} : vector<2x8x8xbf16>, vector<2x8x64xbf16>, vector<2x8x64xf32> -> vector<2x8x64xf32>
    "tpu.trace_stop"() : () -> ()
    %264 = tpu.concatenate %241, %263 in 2 : vector<2x8x64xf32>, vector<2x8x64xf32> -> vector<2x8x128xf32>
    %265 = vector.shape_cast %264 : vector<2x8x128xf32> to vector<16x128xf32>
    %266 = arith.truncf %265 : vector<16x128xf32> to vector<16x128xbf16>
    %c1_104 = arith.constant 1 : index
    %c0_105 = arith.constant 0 : index
    %c0_106 = arith.constant 0 : index
    %267 = vector.load %arg9[%c1_104, %c0_105, %c0_106] : memref<2x128x128xbf16, #tpu.memory_space<vmem>>, vector<1x128x128xbf16>
    %268 = vector.shape_cast %267 : vector<1x128x128xbf16> to vector<128x128xbf16>
    %cst_107 = arith.constant dense<0.000000e+00> : vector<16x128xf32>
    %269 = tpu.matmul %266, %268, %cst_107 {dimension_numbers = #tpu.dot_dimension_numbers<[1], [0], [0], [1], [0, 0, 1, 1], [], []>} : vector<16x128xbf16>, vector<128x128xbf16>, vector<16x128xf32> -> vector<16x128xf32>
    %c1_108 = arith.constant 1 : index
    %c0_109 = arith.constant 0 : index
    %c0_110 = arith.constant 0 : index
    %270 = vector.load %arg10[%c1_108, %c0_109, %c0_110] : memref<2x1x128xf32, #tpu.memory_space<vmem>>, vector<1x1x128xf32>
    %271 = vector.shape_cast %270 : vector<1x1x128xf32> to vector<1x128xf32>
    %272 = vector.broadcast %271 : vector<1x128xf32> to vector<16x128xf32>
    %273 = arith.addf %269, %272 : vector<16x128xf32>
    %274 = arith.addf %205, %273 : vector<16x128xf32>
    %c1_111 = arith.constant 1 : index
    %c0_112 = arith.constant 0 : index
    %c0_113 = arith.constant 0 : index
    %275 = vector.load %arg11[%c1_111, %c0_112, %c0_113] : memref<2x1x128xf32, #tpu.memory_space<vmem>>, vector<1x1x128xf32>
    %276 = vector.shape_cast %275 : vector<1x1x128xf32> to vector<1x128xf32>
    %c1_114 = arith.constant 1 : index
    %c0_115 = arith.constant 0 : index
    %c0_116 = arith.constant 0 : index
    %277 = vector.load %arg12[%c1_114, %c0_115, %c0_116] : memref<2x1x128xf32, #tpu.memory_space<vmem>>, vector<1x1x128xf32>
    %278 = vector.shape_cast %277 : vector<1x1x128xf32> to vector<1x128xf32>
    %cst_117 = arith.constant dense<0.000000e+00> : vector<16xf32>
    %279 = vector.multi_reduction <add>, %274, %cst_117 [1] : vector<16x128xf32> to vector<16xf32>
    %280 = vector.shape_cast %279 : vector<16xf32> to vector<16x1xf32>
    %cst_118 = arith.constant 1.280000e+02 : f32
    %281 = vector.broadcast %cst_118 : f32 to vector<16x1xf32>
    %282 = arith.divf %280, %281 : vector<16x1xf32>
    %283 = vector.broadcast %282 : vector<16x1xf32> to vector<16x128xf32>
    %284 = arith.subf %274, %283 : vector<16x128xf32>
    %285 = arith.mulf %284, %284 : vector<16x128xf32>
    %cst_119 = arith.constant dense<0.000000e+00> : vector<16xf32>
    %286 = vector.multi_reduction <add>, %285, %cst_119 [1] : vector<16x128xf32> to vector<16xf32>
    %287 = vector.shape_cast %286 : vector<16xf32> to vector<16x1xf32>
    %cst_120 = arith.constant 1.280000e+02 : f32
    %288 = vector.broadcast %cst_120 : f32 to vector<16x1xf32>
    %289 = arith.divf %287, %288 : vector<16x1xf32>
    %290 = vector.broadcast %282 : vector<16x1xf32> to vector<16x128xf32>
    %291 = arith.subf %274, %290 : vector<16x128xf32>
    %cst_121 = arith.constant 9.99999996E-13 : f32
    %292 = vector.broadcast %cst_121 : f32 to vector<16x1xf32>
    %293 = arith.addf %289, %292 : vector<16x1xf32>
    %294 = math.rsqrt %293 : vector<16x1xf32>
    %295 = vector.broadcast %294 : vector<16x1xf32> to vector<16x128xf32>
    %296 = arith.mulf %291, %295 : vector<16x128xf32>
    %297 = vector.broadcast %276 : vector<1x128xf32> to vector<16x128xf32>
    %298 = arith.mulf %296, %297 : vector<16x128xf32>
    %299 = vector.broadcast %278 : vector<1x128xf32> to vector<16x128xf32>
    %300 = arith.addf %298, %299 : vector<16x128xf32>
    %301 = arith.truncf %300 : vector<16x128xf32> to vector<16x128xbf16>
    %c1_122 = arith.constant 1 : index
    %c0_123 = arith.constant 0 : index
    %c0_124 = arith.constant 0 : index
    %302 = vector.load %arg13[%c1_122, %c0_123, %c0_124] : memref<2x128x256xbf16, #tpu.memory_space<vmem>>, vector<1x128x256xbf16>
    %303 = vector.shape_cast %302 : vector<1x128x256xbf16> to vector<128x256xbf16>
    %cst_125 = arith.constant dense<0.000000e+00> : vector<16x256xf32>
    %304 = tpu.matmul %301, %303, %cst_125 {dimension_numbers = #tpu.dot_dimension_numbers<[1], [0], [0], [1], [0, 0, 1, 1], [], []>} : vector<16x128xbf16>, vector<128x256xbf16>, vector<16x256xf32> -> vector<16x256xf32>
    %c1_126 = arith.constant 1 : index
    %c0_127 = arith.constant 0 : index
    %c0_128 = arith.constant 0 : index
    %305 = vector.load %arg14[%c1_126, %c0_127, %c0_128] : memref<2x1x256xf32, #tpu.memory_space<vmem>>, vector<1x1x256xf32>
    %306 = vector.shape_cast %305 : vector<1x1x256xf32> to vector<1x256xf32>
    %307 = vector.broadcast %306 : vector<1x256xf32> to vector<16x256xf32>
    %308 = arith.addf %304, %307 : vector<16x256xf32>
    %309 = arith.mulf %308, %308 : vector<16x256xf32>
    %310 = arith.mulf %308, %309 : vector<16x256xf32>
    %cst_129 = arith.constant 4.471500e-02 : f32
    %311 = vector.broadcast %cst_129 : f32 to vector<16x256xf32>
    %312 = arith.mulf %311, %310 : vector<16x256xf32>
    %313 = arith.addf %308, %312 : vector<16x256xf32>
    %cst_130 = arith.constant 0.797884583 : f32
    %314 = vector.broadcast %cst_130 : f32 to vector<16x256xf32>
    %315 = arith.mulf %314, %313 : vector<16x256xf32>
    %316 = math.tanh %315 : vector<16x256xf32>
    %cst_131 = arith.constant 1.000000e+00 : f32
    %317 = vector.broadcast %cst_131 : f32 to vector<16x256xf32>
    %318 = arith.addf %317, %316 : vector<16x256xf32>
    %cst_132 = arith.constant 5.000000e-01 : f32
    %319 = vector.broadcast %cst_132 : f32 to vector<16x256xf32>
    %320 = arith.mulf %319, %318 : vector<16x256xf32>
    %321 = arith.mulf %308, %320 : vector<16x256xf32>
    %322 = arith.truncf %321 : vector<16x256xf32> to vector<16x256xbf16>
    %c1_133 = arith.constant 1 : index
    %c0_134 = arith.constant 0 : index
    %c0_135 = arith.constant 0 : index
    %323 = vector.load %arg15[%c1_133, %c0_134, %c0_135] : memref<2x256x128xbf16, #tpu.memory_space<vmem>>, vector<1x256x128xbf16>
    %324 = vector.shape_cast %323 : vector<1x256x128xbf16> to vector<256x128xbf16>
    %cst_136 = arith.constant dense<0.000000e+00> : vector<16x128xf32>
    %325 = tpu.matmul %322, %324, %cst_136 {dimension_numbers = #tpu.dot_dimension_numbers<[1], [0], [0], [1], [0, 0, 1, 1], [], []>} : vector<16x256xbf16>, vector<256x128xbf16>, vector<16x128xf32> -> vector<16x128xf32>
    %c1_137 = arith.constant 1 : index
    %c0_138 = arith.constant 0 : index
    %c0_139 = arith.constant 0 : index
    %326 = vector.load %arg16[%c1_137, %c0_138, %c0_139] : memref<2x1x128xf32, #tpu.memory_space<vmem>>, vector<1x1x128xf32>
    %327 = vector.shape_cast %326 : vector<1x1x128xf32> to vector<1x128xf32>
    %328 = vector.broadcast %327 : vector<1x128xf32> to vector<16x128xf32>
    %329 = arith.addf %325, %328 : vector<16x128xf32>
    %330 = arith.addf %300, %329 : vector<16x128xf32>
    %c1_140 = arith.constant 1 : index
    %c0_141 = arith.constant 0 : index
    %c0_142 = arith.constant 0 : index
    %331 = vector.load %arg17[%c1_140, %c0_141, %c0_142] : memref<2x1x128xf32, #tpu.memory_space<vmem>>, vector<1x1x128xf32>
    %332 = vector.shape_cast %331 : vector<1x1x128xf32> to vector<1x128xf32>
    %c1_143 = arith.constant 1 : index
    %c0_144 = arith.constant 0 : index
    %c0_145 = arith.constant 0 : index
    %333 = vector.load %arg18[%c1_143, %c0_144, %c0_145] : memref<2x1x128xf32, #tpu.memory_space<vmem>>, vector<1x1x128xf32>
    %334 = vector.shape_cast %333 : vector<1x1x128xf32> to vector<1x128xf32>
    %cst_146 = arith.constant dense<0.000000e+00> : vector<16xf32>
    %335 = vector.multi_reduction <add>, %330, %cst_146 [1] : vector<16x128xf32> to vector<16xf32>
    %336 = vector.shape_cast %335 : vector<16xf32> to vector<16x1xf32>
    %cst_147 = arith.constant 1.280000e+02 : f32
    %337 = vector.broadcast %cst_147 : f32 to vector<16x1xf32>
    %338 = arith.divf %336, %337 : vector<16x1xf32>
    %339 = vector.broadcast %338 : vector<16x1xf32> to vector<16x128xf32>
    %340 = arith.subf %330, %339 : vector<16x128xf32>
    %341 = arith.mulf %340, %340 : vector<16x128xf32>
    %cst_148 = arith.constant dense<0.000000e+00> : vector<16xf32>
    %342 = vector.multi_reduction <add>, %341, %cst_148 [1] : vector<16x128xf32> to vector<16xf32>
    %343 = vector.shape_cast %342 : vector<16xf32> to vector<16x1xf32>
    %cst_149 = arith.constant 1.280000e+02 : f32
    %344 = vector.broadcast %cst_149 : f32 to vector<16x1xf32>
    %345 = arith.divf %343, %344 : vector<16x1xf32>
    %346 = vector.broadcast %338 : vector<16x1xf32> to vector<16x128xf32>
    %347 = arith.subf %330, %346 : vector<16x128xf32>
    %cst_150 = arith.constant 9.99999996E-13 : f32
    %348 = vector.broadcast %cst_150 : f32 to vector<16x1xf32>
    %349 = arith.addf %345, %348 : vector<16x1xf32>
    %350 = math.rsqrt %349 : vector<16x1xf32>
    %351 = vector.broadcast %350 : vector<16x1xf32> to vector<16x128xf32>
    %352 = arith.mulf %347, %351 : vector<16x128xf32>
    %353 = vector.broadcast %332 : vector<1x128xf32> to vector<16x128xf32>
    %354 = arith.mulf %352, %353 : vector<16x128xf32>
    %355 = vector.broadcast %334 : vector<1x128xf32> to vector<16x128xf32>
    %356 = arith.addf %354, %355 : vector<16x128xf32>
    %357 = arith.truncf %356 : vector<16x128xf32> to vector<16x128xbf16>
    %c0_151 = arith.constant 0 : index
    %c0_152 = arith.constant 0 : index
    %358 = vector.load %arg19[%c0_151, %c0_152] : memref<128x128xbf16, #tpu.memory_space<vmem>>, vector<128x128xbf16>
    %cst_153 = arith.constant dense<0.000000e+00> : vector<16x128xf32>
    %359 = tpu.matmul %357, %358, %cst_153 {dimension_numbers = #tpu.dot_dimension_numbers<[1], [0], [0], [1], [0, 0, 1, 1], [], []>} : vector<16x128xbf16>, vector<128x128xbf16>, vector<16x128xf32> -> vector<16x128xf32>
    %c0_154 = arith.constant 0 : index
    %c0_155 = arith.constant 0 : index
    %360 = vector.load %arg20[%c0_154, %c0_155] : memref<1x128xf32, #tpu.memory_space<vmem>>, vector<1x128xf32>
    %361 = vector.broadcast %360 : vector<1x128xf32> to vector<16x128xf32>
    %362 = arith.addf %359, %361 : vector<16x128xf32>
    %c0_156 = arith.constant 0 : index
    %c0_157 = arith.constant 0 : index
    %363 = vector.load %arg21[%c0_156, %c0_157] : memref<16x128xf32, #tpu.memory_space<vmem>>, vector<16x128xf32>
    tpu.vector_store %arg21[%c0_156, %c0_157], %362 {strides = array<i32>} : memref<16x128xf32, #tpu.memory_space<vmem>>, vector<16x128xf32>,
    return
  }
}

</mosaic_0001>

<bundles_post_ra>
// kernel: koelectra_forward.1
= control target key start
LH: loop header
LB: loop body
LE: loop exit
PB: predicated region body
PF: predicated region fallthrough
CT: control target
= control target key end

     0   :  { %s4587_s0 = inlined_call_operand.vmem [shape: s32[16,1], index: 0, kind: input, shape index: {}]   ;;  %s4588_s1 = inlined_call_operand.vmem [shape: s32[16,1], index: 1, kind: input, shape index: {}]   ;;  %s4589_s2 = inlined_call_operand.vmem [shape: s32[2,8], index: 2, kind: input, shape index: {}]   ;;  %s4590_s3 = inlined_call_operand.hbm [shape: bf16[128,128], index: 3, kind: input, shape index: {}]   ;;  %s4591_s4 = inlined_call_operand.hbm [shape: f32[64,128], index: 4, kind: input, shape index: {}]   ;;  %s4592_s5 = inlined_call_operand.vmem [shape: f32[1,128], index: 5, kind: input, shape index: {}]   ;;  %s4593_s6 = inlined_call_operand.vmem [shape: f32[1,128], index: 6, kind: input, shape index: {}]   ;;  %s4594_s7 = inlined_call_operand.hbm [shape: bf16[2,128,384], index: 7, kind: input, shape index: {}]   ;;  %s4595_s8 = inlined_call_operand.vmem [shape: f32[2,1,384], index: 8, kind: input, shape index: {}]   ;;  %s4596_s9 = inlined_call_operand.hbm [shape: bf16[2,128,128], index: 9, kind: input, shape index: {}]   ;;  %s4597_s10 = inlined_call_operand.vmem [shape: f32[2,1,128], index: 10, kind: input, shape index: {}]   ;;  %s4598_s11 = inlined_call_operand.vmem [shape: f32[2,1,128], index: 11, kind: input, shape index: {}]   ;;  %s4599_s12 = inlined_call_operand.vmem [shape: f32[2,1,128], index: 12, kind: input, shape index: {}]   ;;  %s4600_s13 = inlined_call_operand.hbm [shape: bf16[2,128,256], index: 13, kind: input, shape index: {}]   ;;  %s4601_s14 = inlined_call_operand.vmem [shape: f32[2,1,256], index: 14, kind: input, shape index: {}]   ;;  %s4602_s15 = inlined_call_operand.hbm [shape: bf16[2,256,128], index: 15, kind: input, shape index: {}]   ;;  %s4603_s16 = inlined_call_operand.vmem [shape: f32[2,1,128], index: 16, kind: input, shape index: {}]   ;;  %s4604_s17 = inlined_call_operand.vmem [shape: f32[2,1,128], index: 17, kind: input, shape index: {}]   ;;  %s4605_s18 = inlined_call_operand.vmem [shape: f32[2,1,128], index: 18, kind: input, shape index: {}]   ;;  %s4606_s19 = inlined_call_operand.hbm [shape: bf16[128,128], index: 19, kind: input, shape index: {}]   ;;  %s4607_s20 = inlined_call_operand.vmem [shape: f32[1,128], index: 20, kind: input, shape index: {}]   ;;  %s4608_s21 = inlined_call_operand.vmem [shape: f32[16,128], index: 21, kind: output, shape index: {}]  }
   0x1   :  { %4611 = sst [smem:[#allocation17_spill]] %s4587_s0 }
   0x2   :  { %4612 = sst [smem:[#allocation18_spill]] %s4588_s1 }
   0x3   :  { %4613 = sst [smem:[#allocation19_spill]] %s4589_s2 }
   0x4   :  { %4614 = sst [smem:[#allocation20_spill]] %s4590_s3 }
   0x5   :  { %4615 = sst [smem:[#allocation21_spill]] %s4591_s4 }
   0x6   :  { %4616 = sst [smem:[#allocation22_spill]] %s4592_s5 }
   0x7   :  { %26 = vsyncpa [#allocation3], 0 }
   0x8   :  { %27 = vsyncpa [#allocation5], 0 }
   0x9   :  { %28 = vsyncpa [#allocation8], 0 }
   0xa   :  { %29 = vsyncpa [#allocation11], 0  ;;  %s4033_s2 = smov [#allocation4]  }
   0xb   :  { %s53_s25 = sshll.u32 %s4033_s2, 4  ;;  %s54_s25 = int_to_ptr.vmem [resolvable:$true] %s53_s25 }
   0xc   :  { %s3893_s26 = scalar_lea.vmem %s54_s25, 1024  ;;  %p3898_p1 = scmp.lt.s32.totalorder %s54_s25, %s54_s25 }
   0xd   :  { %p3894_p0 = scmp.ne.s32.totalorder %s54_s25, %s3893_s26  ;;  %p3899_p2 = scmp.lt.s32.totalorder %s3893_s26, %s3893_s26 }
   0xf   :  { %p3900_p3 = por %p3899_p2, %p3898_p1 }
  0x11   :  { %p3901_p4 = pnand %p3900_p3, %p3894_p0 }
  0x13   :  { %3904 = shalt.err (!%p3901_p4)
}
  0x14   :  { %s4034_s27 = smov 128   ;;  %s4035_s3 = smov 8  }
  0x15   :  { %s4617_s0 = sld [smem:[#allocation21_spill]]  ;;  %s4036_s4 = smov [#allocation7]  }
  0x16   :  { %s83_s30 = sshll.u32 %s4036_s4, 4  ;;  %s4037_s5 = smov [#allocation10]   ;;  %s84_s30 = int_to_ptr.vmem [resolvable:$true] %s83_s30 }
  0x17   :  { %s115_s22 = sshll.u32 %s4037_s5, 4  ;;  %s3913_s23 = scalar_lea.vmem %s84_s30, 2048  ;;  %s116_s22 = int_to_ptr.vmem [resolvable:$true] %s115_s22 }
  0x18   :  { %p3914_p5 = scmp.ne.s32.totalorder %s84_s30, %s3913_s23  ;;  %p3918_p6 = scmp.lt.s32.totalorder %s84_s30, %s84_s30 }
  0x19   :  { %p3919_p7 = scmp.lt.s32.totalorder %s3913_s23, %s3913_s23 }
  0x1b   :  { %59 = dma.hbm_to_vmem [thread:$0]  %s4617_s0, 1024, %s54_s25, [#allocation5], %s4034_s27, %s4034_s27, %s4035_s3  }
  0x1c   :  { %p3920_p8 = por %p3919_p7, %p3918_p6 }
  0x1e   :  { %p3921_p9 = pnand %p3920_p8, %p3914_p5 }
  0x20   :  { %3924 = shalt.err (!%p3921_p9)
}
  0x21   :  { %s4038_s1 = smov 64   ;;  %s4039_s24 = smov 4  }
  0x22   :  { %89 = dma.hbm_to_vmem [thread:$0]  %s4596_s9, 2048, %s84_s30, [#allocation8], %s4038_s1, %s4038_s1, %s4039_s24  }
  0x23   :  { %s3933_s25 = scalar_lea.vmem %s116_s22, 4096  ;;  %p3938_p11 = scmp.lt.s32.totalorder %s116_s22, %s116_s22 }
  0x24   :  { %p3934_p10 = scmp.ne.s32.totalorder %s116_s22, %s3933_s25  ;;  %p3939_p12 = scmp.lt.s32.totalorder %s3933_s25, %s3933_s25 }
  0x26   :  { %p3940_p13 = por %p3939_p12, %p3938_p11 }
  0x28   :  { %p3941_p0 = pnand %p3940_p13, %p3934_p10 }
  0x2a   :  { %3944 = shalt.err (!%p3941_p0)
}
  0x2b   :  { %121 = dma.hbm_to_vmem [thread:$0]  %s4602_s15, 4096, %s116_s22, [#allocation11], %s4038_s1, %s4038_s1, %s4039_s24  }
  0x2c   :  { %s4040_s0 = smov [#allocation2]   ;;  %s4041_s5 = smov [#allocation6]  }
  0x2d   :  { %s41_s4 = sshll.u32 %s4040_s0, 4  ;;  %s69_s9 = sshll.u32 %s4041_s5, 4  ;;  %s42_s4 = int_to_ptr.vmem [resolvable:$true] %s41_s4  ;;  %s70_s9 = int_to_ptr.vmem [resolvable:$true] %s69_s9 }
  0x2e   :  { %s3953_s30 = scalar_lea.vmem %s42_s4, 1024  ;;  %p3958_p2 = scmp.lt.s32.totalorder %s42_s4, %s42_s4 }
  0x2f   :  { %p3954_p1 = scmp.ne.s32.totalorder %s42_s4, %s3953_s30  ;;  %p3959_p3 = scmp.lt.s32.totalorder %s3953_s30, %s3953_s30 }
  0x31   :  { %p3960_p4 = por %p3959_p3, %p3958_p2 }
  0x33   :  { %p3961_p5 = pnand %p3960_p4, %p3954_p1 }
  0x35   :  { %3964 = shalt.err (!%p3961_p5)
}
  0x36   :  { %s4618_s26 = sld [smem:[#allocation20_spill]]  ;;  %s3973_s15 = scalar_lea.vmem %s70_s9, 6144 }
  0x37   :  { %p3974_p6 = scmp.ne.s32.totalorder %s70_s9, %s3973_s15  ;;  %p3978_p7 = scmp.lt.s32.totalorder %s70_s9, %s70_s9 }
  0x38   :  { %p3979_p8 = scmp.lt.s32.totalorder %s3973_s15, %s3973_s15 }
  0x3a   :  { %p3980_p9 = por %p3979_p8, %p3978_p7 }
  0x3c   :  { %47 = dma.hbm_to_vmem [thread:$0]  %s4618_s26, 1024, %s42_s4, [#allocation3], %s4038_s1, %s4038_s1, %s4039_s24  }
  0x3d   :  { %p3981_p10 = pnand %p3980_p9, %p3974_p6 }
  0x3f   :  { %3984 = shalt.err (!%p3981_p10)
}
  0x40   :  { %s4042_s22 = smov 192   ;;  %s4043_s25 = smov 12  }
  0x41   :  { %75 = dma.hbm_to_vmem [thread:$0]  %s4594_s7, 6144, %s70_s9, [#allocation5], %s4042_s22, %s4042_s22, %s4043_s25  }
  0x42   :  { %s4044_s0 = smov [#allocation9]   ;;  %s4045_s30 = smov [#allocation12]  }
  0x43   :  { %s101_s5 = sshll.u32 %s4044_s0, 4  ;;  %s133_s23 = sshll.u32 %s4045_s30, 4  ;;  %s102_s5 = int_to_ptr.vmem [resolvable:$true] %s101_s5  ;;  %s134_s23 = int_to_ptr.vmem [resolvable:$true] %s133_s23 }
  0x44   :  { %s3993_s4 = scalar_lea.vmem %s102_s5, 4096  ;;  %p3998_p12 = scmp.lt.s32.totalorder %s102_s5, %s102_s5 }
  0x45   :  { %p3994_p11 = scmp.ne.s32.totalorder %s102_s5, %s3993_s4  ;;  %p3999_p13 = scmp.lt.s32.totalorder %s3993_s4, %s3993_s4 }
  0x47   :  { %p4000_p0 = por %p3999_p13, %p3998_p12 }
  0x49   :  { %p4001_p1 = pnand %p4000_p0, %p3994_p11 }
  0x4b   :  { %4004 = shalt.err (!%p4001_p1)
}
  0x4c   :  { %107 = dma.hbm_to_vmem [thread:$0]  %s4600_s13, 4096, %s102_s5, [#allocation8], %s4034_s27, %s4034_s27, %s4035_s3  }
  0x4d   :  { %s4013_s7 = scalar_lea.vmem %s134_s23, 1024  ;;  %p4018_p3 = scmp.lt.s32.totalorder %s134_s23, %s134_s23 }
  0x4e   :  { %p4014_p2 = scmp.ne.s32.totalorder %s134_s23, %s4013_s7  ;;  %p4019_p4 = scmp.lt.s32.totalorder %s4013_s7, %s4013_s7 }
  0x50   :  { %p4020_p5 = por %p4019_p4, %p4018_p3 }
  0x52   :  { %p4021_p6 = pnand %p4020_p5, %p4014_p2 }
  0x54   :  { %4024 = shalt.err (!%p4021_p6)
}
  0x55   :  { %139 = dma.hbm_to_vmem [thread:$0]  %s4606_s19, 1024, %s134_s23, [#allocation11], %s4038_s1, %s4038_s1, %s4039_s24  }
  0x56   :  { %4025 = dma.done.wait [#allocation3], 1024  }
  0x57   :  { %4026 = vsyncadd [#allocation3], 4294966272 }
  0x58   :  { %4027 = dma.done.wait [#allocation5], 7168  }
  0x59   :  { %4028 = vsyncadd [#allocation5], 4294960128 }
  0x5a   :  { %4029 = dma.done.wait [#allocation8], 6144  }
  0x5b   :  { %4030 = vsyncadd [#allocation8], 4294961152 }
  0x5c   :  { %4031 = dma.done.wait [#allocation11], 5120  }
  0x5d   :  { %4032 = vsyncadd [#allocation11], 4294962176  ;;  %v4046_v0 = vmov 0   ;;  %v4047_v1 = vmov 0.0   ;;  %s4619_s27 = sld [smem:[#allocation17_spill]]  ;;  %v3641_v7 = vld [vmem:[#allocation2 + $0x38] sm:$0xff]   ;;  %v164_v16 = vlaneseq }
  0x5e   :  { %3629 = vset.pattern.permute.xlu0 %v4046_v0  ;;  %3630 = vset.pattern.permute.xlu1 %v4046_v0  ;;  %s4620_s22 = sld [smem:[#allocation18_spill]]  ;;  %v3642_v9 = vld [vmem:[#allocation2 + $0x30] sm:$0xff]   ;;  %vm4048_vm0 = vmmov 0   ;;  %v3643_v10 = vld [vmem:[#allocation2 + $0x28] sm:$0xff]   ;;  %v3644_v11 = vld [vmem:[#allocation2 + $0x20] sm:$0xff]   ;;  %vm647_vm5 = vcmask 523264  }
  0x5f   :  { %3396 = vmatprep.subr.bf16.mxu0 %v4047_v1  ;;  %589 = vmatprep.mubr.bf16.mxu1 %v4046_v0  ;;  %v3645_v12 = vld [vmem:[#allocation2 + $0x18] sm:$0xff]   ;;  %v3646_v13 = vld [vmem:[#allocation2 + $0x10] sm:$0xff]   ;;  %v3647_v14 = vld [vmem:[#allocation2 + $0x8] sm:$0xff]   ;;  %v165_v17 = vand.u32 127, %v164_v16  ;;  %s4621_s23 = sld [smem:[#allocation22_spill]]  ;;  %vm772_vm6 = vcmask 1043456  }
  0x60   :  { %3397 = vmatpush3.bf16.msra.mxu0 %v3641_v7  ;;  %3412 = vmatprep.mubr.msk.bf16.mxu0 %vm4048_vm0, %v4047_v1  ;;  %v3648_v15 = vld [vmem:[#allocation2] sm:$0xff]   ;;  %v3649_v36 = vld [vmem:[#allocation6 + $0xac] ss:$12 sps:$4 sm:$0xff]   ;;  %v3651_v37 = vld [vmem:[#allocation6 + $0xa8] ss:$12 sps:$4 sm:$0xff]   ;;  %s4622_s15 = sld [smem:[#allocation19_spill]] }
  0x61   :  { %3398 = vmatprep.subr.bf16.mxu0 %v4047_v1  ;;  %v211_v29 = vld [vmem:[#allocation4] sm:$0xff]  ;;  %v3652_v38 = vld [vmem:[#allocation6 + $0xb0] ss:$12 sps:$4 sm:$0xff]   ;;  %557 = vmatprep.subr.bf16.mxu1 %v3649_v36  ;;  %v3664_v55 = vld [vmem:[#allocation6 + $0x68] ss:$12 sps:$4 sm:$0xff]   ;;  %vm744_vm7 = vcmask 64512  }
  0x62   :  { %558 = vmatpush1.bf16.msra.mxu1 %v3651_v37  ;;  %v3653_v47 = vld [vmem:[#allocation6 + $0x94] ss:$12 sps:$4 sm:$0xff]   ;;  %v3655_v48 = vld [vmem:[#allocation6 + $0x90] ss:$12 sps:$4 sm:$0xff]   ;;  %v3656_v49 = vld [vmem:[#allocation6 + $0x98] ss:$12 sps:$4 sm:$0xff]  }
  0x63   :  { %v166_v2 = vld [vmem:[%s4619_s27] sm:$0xff]  ;;  %v167_v4 = vld [vmem:[%s4619_s27 + $0x8] sm:$0xff]  ;;  %559 = vmatprep.subr.bf16.mxu1 %v3653_v47  ;;  %v3668_v58 = vld [vmem:[#allocation6 + $0x50] ss:$12 sps:$4 sm:$0xff]  }
  0x64   :  { %v178_v3 = vld [vmem:[%s4620_s22] sm:$0xff]  ;;  %169 = vperm.xlu0 %3629, %v166_v2   ;;  %v179_v6 = vld [vmem:[%s4620_s22 + $0x8] sm:$0xff]  ;;  %3399 = vmatpush3.bf16.msra.mxu0 %v3642_v9  ;;  %v3671_v60 = vld [vmem:[#allocation6 + $0x30] ss:$12 sps:$4 sm:$0xff]  }
  0x65   :  { %v180_v5 = vadd.s32 120, %v178_v3  ;;  %v181_v8 = vadd.s32 120, %v179_v6  ;;  %3400 = vmatprep.subr.bf16.mxu0 %v4047_v1  ;;  %v3657_v50 = vld [vmem:[#allocation6 + $0x7c] ss:$12 sps:$4 sm:$0xff]   ;;  %v3659_v51 = vld [vmem:[#allocation6 + $0x78] ss:$12 sps:$4 sm:$0xff]  }
  0x66   :  { %560 = vmatpush1.bf16.msra.mxu1 %v3655_v48  ;;  %v3660_v52 = vld [vmem:[#allocation6 + $0x80] ss:$12 sps:$4 sm:$0xff]   ;;  %v3661_v53 = vld [vmem:[#allocation6 + $0x64] ss:$12 sps:$4 sm:$0xff]   ;;  %v3667_v57 = vld [vmem:[#allocation6 + $0x48] ss:$12 sps:$4 sm:$0xff]  }
  0x67   :  { %183 = vperm.xlu1 %3630, %v180_v5   ;;  %561 = vmatprep.subr.bf16.mxu1 %v3657_v50  ;;  %v3663_v54 = vld [vmem:[#allocation6 + $0x60] ss:$12 sps:$4 sm:$0xff]   ;;  %v3672_v61 = vld [vmem:[#allocation6 + $0x38] ss:$12 sps:$4 sm:$0xff]   ;;  %v3673_v62 = vld [vmem:[#allocation6 + $0x1c] ss:$12 sps:$4 sm:$0xff]  }
  0x68   :  { %172 = vperm.xlu0 %3629, %v167_v4   ;;  %3401 = vmatpush3.bf16.msra.mxu0 %v3643_v10  ;;  %v3665_v56 = vld [vmem:[#allocation6 + $0x4c] ss:$12 sps:$4 sm:$0xff]   ;;  %v3669_v59 = vld [vmem:[#allocation6 + $0x34] ss:$12 sps:$4 sm:$0xff]   ;;  %v3677_v3 = vld [vmem:[#allocation6 + $0x4] ss:$12 sps:$4 sm:$0xff]  }
  0x69   :  { %3402 = vmatprep.subr.bf16.mxu0 %v4047_v1  ;;  %v3675_v63 = vld [vmem:[#allocation6 + $0x18] ss:$12 sps:$4 sm:$0xff]   ;;  %v3676_v2 = vld [vmem:[#allocation6 + $0x20] ss:$12 sps:$4 sm:$0xff]   ;;  %v3680_v5 = vld [vmem:[#allocation6 + $0x8] ss:$12 sps:$4 sm:$0xff]  }
  0x6a   :  { %562 = vmatpush1.bf16.msra.mxu1 %v3659_v51  ;;  %v3679_v4 = vld [vmem:[#allocation6] ss:$12 sps:$4 sm:$0xff]  }
  0x6b   :  { %186 = vperm.xlu1 %3630, %v181_v8   ;;  %563 = vmatprep.subr.bf16.mxu1 %v3661_v53  ;;  %v342_v53 = vld [vmem:[%s4622_s15] sm:$0x3] }
  0x6c   :  { %3403 = vmatpush3.bf16.msra.mxu0 %v3644_v11 }
  0x6d   :  { %3404 = vmatprep.subr.bf16.mxu0 %v4047_v1 }
  0x6e   :  { %564 = vmatpush1.bf16.msra.mxu1 %v3663_v54  ;;  %v343_v54 = vcvt.s32.f32 %v342_v53 }
  0x6f   :  { %565 = vmatprep.subr.bf16.mxu1 %v3665_v56 }
  0x70   :  { %3405 = vmatpush3.bf16.msra.mxu0 %v3645_v12 }
  0x71   :  { %3406 = vmatprep.subr.bf16.mxu0 %v4047_v1 }
  0x72   :  { %566 = vmatpush1.bf16.msra.mxu1 %v3667_v57  ;;  %v344_v57 = vsub.f32 1.0, %v343_v54 }
  0x73   :  { %567 = vmatprep.subr.bf16.mxu1 %v3669_v59 }
  0x74   :  { %3407 = vmatpush3.bf16.msra.mxu0 %v3646_v13  ;;  %v345_v59 = vmul.f32 -10000.0, %v344_v57 }
  0x75   :  { %3408 = vmatprep.subr.bf16.mxu0 %v4047_v1 }
  0x76   :  { %568 = vmatpush1.bf16.msra.mxu1 %v3671_v60 }
  0x77   :  { %569 = vmatprep.subr.bf16.mxu1 %v3673_v62 }
  0x78   :  { %3409 = vmatpush3.bf16.msra.mxu0 %v3647_v14  ;;  %v3091_v14 = vld [vmem:[%s4621_s23] ss:$0 sm:$0xff] }
  0x79   :  { %3410 = vmatprep.subr.bf16.mxu0 %v4047_v1 }
  0x7a   :  { %570 = vmatpush1.bf16.msra.mxu1 %v3675_v63 }
  0x7b   :  { %571 = vmatprep.subr.bf16.mxu1 %v3677_v3 }
  0x7c   :  { %3411 = vmatpush3.bf16.msra.mxu0 %v3648_v15 }
  0x7d   :  { %3416 = vmatprep.subr.bf16.mxu0 %v4047_v1 }
  0x7e   :  { %572 = vmatpush1.bf16.msra.mxu1 %v3679_v4 }
  0x7f   :  { %3436 = vmatprep.subr.bf16.mxu1 %v4047_v1 }
  0xdf   :  { %v170_v18 = vpop.permute.xlu0 %169 }
  0xe0   :  { %vm174_vm1 = vcmp.eq.s32.totalorder %v165_v17, %v170_v18 }
  0xe1   :  { %v176_v21 = vsel %vm174_vm1, 1.0, %v4047_v1 }
  0xe2   :  { %v184_v19 = vpop.permute.xlu1 %183 }
  0xe3   :  { %vm188_vm2 = vcmp.eq.s32.totalorder %v165_v17, %v184_v19  ;;  %v173_v20 = vpop.permute.xlu0 %172  ;;  %v3092_v19 = vld [vmem:[%s4593_s6] ss:$0 sm:$0xff] }
  0xe4   :  { %vm175_vm3 = vcmp.eq.s32.totalorder %v165_v17, %v173_v20  ;;  %v190_v22 = vsel %vm188_vm2, 1.0, %v4047_v1 }
  0xe5   :  { %v177_v24 = vsel %vm175_vm3, 1.0, %v4047_v1  ;;  %v192_v26 = vadd.f32 %v190_v22, %v176_v21 }
  0xe6   :  { %v187_v23 = vpop.permute.xlu1 %186 }
  0xe7   :  { %vm189_vm4 = vcmp.eq.s32.totalorder %v165_v17, %v187_v23 }
  0xe8   :  { %v191_v25 = vsel %vm189_vm4, 1.0, %v4047_v1 }
  0xe9   :  { %v193_v27 = vadd.f32 %v191_v25, %v177_v24  ;;  %v4268_v24 = vshrl.u32 %v164_v16, 7 }
  0xeb   :  { %v194_v28 = vpack.c.bf16 %v193_v27, %v192_v26  ;;  %v4271_v25 = vsub.s32 1, %v4268_v24  ;;  %v412_v26 = vld [vmem:[%s4595_s8] sm:$0x7]  ;;  %v424_v27 = vsub.s32 2, %v4268_v24 }
  0xed   :  { %3413 = vmatmul.mubr.bf16.vlgmr.msra.gmra.mxu0 %v194_v28  ;;  %v421_v28 = vrot.slane %v412_v26, %v4271_v25  ;;  %v425_v16 = vrot.slane %v412_v26, %v424_v27 }
  0xee   :  { %3432 = vmatprep.mubr.msk.bf16.mxu0 %vm4048_vm0, %v4047_v1  ;;  %3417 = vmatpush3.bf16.msra.mxu0 %v3652_v38 }
  0xef   :  { %3418 = vmatprep.subr.bf16.mxu0 %v4047_v1 }
  0xf2   :  { %3419 = vmatpush3.bf16.msra.mxu0 %v3656_v49 }
  0xf3   :  { %3420 = vmatprep.subr.bf16.mxu0 %v4047_v1 }
  0xf6   :  { %3421 = vmatpush3.bf16.msra.mxu0 %v3660_v52 }
  0xf7   :  { %3422 = vmatprep.subr.bf16.mxu0 %v4047_v1 }
  0xfa   :  { %3423 = vmatpush3.bf16.msra.mxu0 %v3664_v55  ;;  %v4049_v55 = vmov 1966171168  }
  0xfb   :  { %3424 = vmatprep.subr.bf16.mxu0 %v4047_v1  ;;  %v348_v56 = vunpack.c.l.s4 %v4049_v55 }
  0xfe   :  { %3425 = vmatpush3.bf16.msra.mxu0 %v3668_v58  ;;  %v349_v58 = vunpack.c.0.s8 %v348_v56 }
  0xff   :  { %3426 = vmatprep.subr.bf16.mxu0 %v4047_v1 }
 0x100   :  { %v352_v60 = vsub.s32 %v349_v58, %v4268_v24 }
 0x102   :  { %3427 = vmatpush3.bf16.msra.mxu0 %v3672_v61  ;;  %v353_v61 = vrot.slane %v345_v59, %v352_v60 }
 0x103   :  { %3428 = vmatprep.subr.bf16.mxu0 %v4047_v1 }
 0x104   :  { %v361_v62 = vrot.slane %v353_v61, %v352_v60 }
 0x106   :  { %3429 = vmatpush3.bf16.msra.mxu0 %v3676_v2  ;;  %v354_v2 = vcombine.high %v353_v61, %v353_v61 }
 0x107   :  { %3430 = vmatprep.subr.bf16.mxu0 %v4047_v1 }
 0x10a   :  { %3431 = vmatpush3.bf16.msra.mxu0 %v3680_v5 }
 0x10b   :  { %3460 = vmatprep.subr.bf16.mxu0 %v4047_v1 }
 0x1ad   :  { %v294_v30 = vpop.f32.mrf.mxu0 }
 0x1ae   :  { %v295_v31 = vadd.f32 %v294_v30, %v211_v29 }
 0x1af   :  { %v3414_v32 = vpop.f32.mrf.mxu0 }
 0x1b0   :  { %303 = vadd.xlane.f32.xlu0 %v295_v31 }
 0x1b1   :  { %v297_v33 = vpop.f32.mrf.mxu0 }
 0x1b2   :  { %v298_v34 = vadd.f32 %v297_v33, %v211_v29 }
 0x1b3   :  { %v3415_v35 = vpop.f32.mrf.mxu0 }
 0x1b4   :  { %305 = vadd.xlane.f32.xlu1 %v298_v34 }
 0x239   :  { %v304_v39 = vpop.xlane.xlu0 %303 }
 0x23a   :  { %v308_v40 = vmul.f32 0.0078125, %v304_v39 }
 0x23c   :  { %v4233_v41 = vsub.f32 %v295_v31, %v308_v40  ;;  %v4279_v31 = vsub.s32 0, %v4268_v24 }
 0x23d   :  { %v306_v42 = vpop.xlane.xlu1 %305 }
 0x23e   :  { %v309_v43 = vmul.f32 0.0078125, %v306_v42  ;;  %v312_v44 = vmul.f32 %v4233_v41, %v4233_v41  ;;  %v417_v37 = vrot.slane %v412_v26, %v4279_v31  ;;  %v4312_v63 = vrot.slane %v361_v62, %v4279_v31 }
 0x240   :  { %v4237_v45 = vsub.f32 %v298_v34, %v309_v43  ;;  %314 = vadd.xlane.f32.xlu0 %v312_v44 }
 0x242   :  { %v313_v46 = vmul.f32 %v4237_v45, %v4237_v45 }
 0x244   :  { %316 = vadd.xlane.f32.xlu0 %v313_v46 }
 0x2c9   :  { %v315_v6 = vpop.xlane.xlu0 %314 }
 0x2ca   :  { %v318_v7 = vmul.f32 0.0078125, %v315_v6 }
 0x2cc   :  { %v320_v8 = vadd.f32 1e-12, %v318_v7  ;;  %v368_v7 = vrot.slane %v354_v2, %v352_v60 }
 0x2cd   :  { %v317_v9 = vpop.xlane.xlu0 %316 }
 0x2ce   :  { %3817 = vrsqrt.f32 %v320_v8  ;;  %v319_v10 = vmul.f32 0.0078125, %v317_v9 }
 0x2d0   :  { %v321_v11 = vadd.f32 1e-12, %v319_v10 }
 0x2d2   :  { %3819 = vrsqrt.f32 %v321_v11  ;;  %v4317_v11 = vrot.slane %v368_v7, %v4279_v31 }
 0x2db   :  { %v3818_v12 = vpop.eup %3817 }
 0x2dc   :  { %v324_v13 = vmul.f32 %v3818_v12, %v4233_v41 }
 0x2de   :  { %v332_v18 = vmul.f32 %v3091_v14, %v324_v13 }
 0x2df   :  { %v3820_v15 = vpop.eup %3819 }
 0x2e0   :  { %v325_v17 = vmul.f32 %v3820_v15, %v4237_v45  ;;  %v4257_v21 = vadd.f32 %v3092_v19, %v332_v18 }
 0x2e2   :  { %v333_v20 = vmul.f32 %v3091_v14, %v325_v17 }
 0x2e4   :  { %v4259_v22 = vadd.f32 %v3092_v19, %v333_v20 }
 0x2e6   :  { %v379_v23 = vpack.c.bf16 %v4259_v22, %v4257_v21 }
 0x2e8   :  { %590 = vmatmul.mubr.bf16.vlgmr.msra.gmra.mxu1 %v379_v23  ;;  %3433 = vmatmul.mubr.bf16.vlgmr.msra.gmra.mxu0 %v379_v23 }
 0x2e9   :  { %3438 = vmatprep.mubr.msk.bf16.mxu1 %vm4048_vm0, %v4047_v1  ;;  %3462 = vmatprep.mubr.msk.bf16.mxu0 %vm4048_vm0, %v4047_v1 }
 0x3a8   :  { %v591_v29 = vpop.f32.mrf.mxu1  ;;  %v634_v30 = vpop.f32.mrf.mxu0 }
 0x3a9   :  { %v592_v44 = vadd.f32 %v591_v29, %v417_v37  ;;  %v635_v47 = vadd.f32 %v634_v30, %v425_v16 }
 0x3aa   :  { %v593_v32 = vpop.f32.mrf.mxu1  ;;  %v3434_v33 = vpop.f32.mrf.mxu0 }
 0x3ab   :  { %v594_v34 = vadd.f32 %v593_v32, %v421_v28  ;;  %v641_v46 = vpack.c.bf16 %v592_v44, %v592_v44  ;;  %v4299_v50 = vpack.c.bf16 %v635_v47, %v635_v47 }
 0x3ac   :  { %v595_v35 = vpop.f32.mrf.mxu1  ;;  %v637_v36 = vpop.f32.mrf.mxu0 }
 0x3ad   :  { %v4284_v38 = vpack.c.bf16 %v594_v34, %v594_v34  ;;  %v4286_v39 = vadd.f32 %v637_v36, %v425_v16  ;;  %v596_v49 = vadd.f32 %v595_v35, %v417_v37  ;;  %v774_v52 = vsel %vm772_vm6, %v4299_v50, 0 }
 0x3ae   :  { %v597_v40 = vpop.f32.mrf.mxu1  ;;  %v3435_v41 = vpop.f32.mrf.mxu0 }
 0x3af   :  { %v652_v42 = vsel %vm647_vm5, %v4284_v38, 0  ;;  %v598_v43 = vadd.f32 %v597_v40, %v421_v28  ;;  %v642_v51 = vpack.c.bf16 %v596_v49, %v596_v49 }
 0x3b0   :  { %3437 = vmatpush3.bf16.xpose.msra.mxu1 %v652_v42  ;;  %v646_v42 = vpack.c.bf16 %v4286_v39, %v4286_v39 }
 0x3b1   :  { %3442 = vmatprep.subr.bf16.mxu1 %v4047_v1  ;;  %v4291_v45 = vpack.c.bf16 %v598_v43, %v598_v43 }
 0x3b3   :  { %v698_v48 = vsel %vm647_vm5, %v4291_v45, 0 }
 0x3b7   :  { %3439 = vmatmul.mubr.msk.bf16.vlgmr.msra.gmra.mxu1 %vm647_vm5, %v641_v46 }
 0x3b8   :  { %3443 = vmatpush3.bf16.xpose.msra.mxu1 %v698_v48  ;;  %3444 = vmatprep.mubr.msk.bf16.mxu1 %vm4048_vm0, %v4047_v1 }
 0x3b9   :  { %3448 = vmatprep.subr.bf16.mxu1 %v4047_v1 }
 0x3bf   :  { %3445 = vmatmul.mubr.msk.bf16.vlgmr.msra.gmra.mxu1 %vm647_vm5, %v642_v51 }
 0x3c0   :  { %3449 = vmatpush3.bf16.msra.mxu1 %v774_v52  ;;  %3450 = vmatprep.mubr.msk.bf16.mxu1 %vm4048_vm0, %v4047_v1 }
 0x3c1   :  { %3454 = vmatprep.subr.bf16.mxu1 %v4047_v1 }
 0x477   :  { %v688_v3 = vpop.f32.mrf.mxu1 }
 0x478   :  { %v740_v4 = vmul.f32 0.125, %v688_v3 }
 0x479   :  { %v3440_v5 = vpop.f32.mrf.mxu1 }
 0x47a   :  { %v742_v6 = vadd.f32 %v740_v4, %v4312_v63 }
 0x47b   :  { %v691_v8 = vpop.f32.mrf.mxu1 }
 0x47c   :  { %v745_v9 = vsel %vm744_vm7, %v742_v6, -inf }
 0x47d   :  { %746 = vmax.xlane.f32.xlu1 %v745_v9  ;;  %v3441_v10 = vpop.f32.mrf.mxu1 }
 0x47f   :  { %v734_v12 = vpop.f32.mrf.mxu1 }
 0x480   :  { %v741_v13 = vmul.f32 0.125, %v734_v12 }
 0x481   :  { %v3446_v14 = vpop.f32.mrf.mxu1 }
 0x482   :  { %v743_v15 = vadd.f32 %v741_v13, %v4317_v11 }
 0x483   :  { %v737_v17 = vpop.f32.mrf.mxu1 }
 0x484   :  { %v748_v18 = vsel %vm744_vm7, %v743_v15, -inf }
 0x485   :  { %749 = vmax.xlane.f32.xlu0 %v748_v18  ;;  %v3447_v19 = vpop.f32.mrf.mxu1 }
 0x506   :  { %v747_v20 = vpop.xlane.xlu1 %746 }
 0x507   :  { %v751_v23 = vsub.f32 %v742_v6, %v747_v20 }
 0x509   :  { %v753_v26 = vmul.f32 1.442695, %v751_v23 }
 0x50b   :  { %3821 = vpow2.f32 %v753_v26 }
 0x50e   :  { %v750_v28 = vpop.xlane.xlu0 %749 }
 0x50f   :  { %v752_v29 = vsub.f32 %v743_v15, %v750_v28 }
 0x511   :  { %v755_v30 = vmul.f32 1.442695, %v752_v29 }
 0x513   :  { %3823 = vpow2.f32 %v755_v30 }
 0x518   :  { %v3822_v32 = vpop.eup %3821 }
 0x519   :  { %v757_v33 = vsel %vm744_vm7, %v3822_v32, 0.0 }
 0x51a   :  { %758 = vadd.xlane.f32.xlu1 %v757_v33 }
 0x520   :  { %v3824_v16 = vpop.eup %3823 }
 0x521   :  { %v760_v34 = vsel %vm744_vm7, %v3824_v16, 0.0 }
 0x522   :  { %761 = vadd.xlane.f32.xlu0 %v760_v34 }
 0x52b   :  { %866 = vrot.lane.b32.xlu1 %v4284_v38, %s4038_s1 }
 0x52f   :  { %863 = vrot.lane.b32.xlu1 %v641_v46, %s4038_s1 }
 0x533   :  { %915 = vrot.lane.b32.xlu1 %v642_v51, %s4038_s1 }
 0x538   :  { %918 = vrot.lane.b32.xlu0 %v4291_v45, %s4038_s1  ;;  %v820_v45 = vsel %vm772_vm6, %v646_v42, 0 }
 0x5a3   :  { %v759_v35 = vpop.xlane.xlu1 %758 }
 0x5a4   :  { %3825 = vrcp.f32 %v759_v35 }
 0x5a7   :  { %v867_v36 = vpop.permute.xlu1 %866 }
 0x5a8   :  { %v872_v37 = vsel %vm647_vm5, %v867_v36, 0 }
 0x5a9   :  { %3461 = vmatpush3.bf16.xpose.msra.mxu0 %v872_v37 }
 0x5aa   :  { %3472 = vmatprep.subr.bf16.mxu0 %v4047_v1 }
 0x5ab   :  { %v762_v40 = vpop.xlane.xlu0 %761  ;;  %v864_v41 = vpop.permute.xlu1 %863 }
 0x5ac   :  { %3827 = vrcp.f32 %v762_v40 }
 0x5af   :  { %v919_v48 = vpop.permute.xlu0 %918  ;;  %v916_v39 = vpop.permute.xlu1 %915 }
 0x5b0   :  { %3463 = vmatmul.mubr.msk.bf16.vlgmr.msra.gmra.mxu0 %vm647_vm5, %v864_v41  ;;  %v924_v51 = vsel %vm647_vm5, %v919_v48, 0  ;;  %v3687_v48 = vld [vmem:[#allocation7 + $0x8] sm:$0xff]  }
 0x5b1   :  { %v3826_v38 = vpop.eup %3825  ;;  %3474 = vmatprep.mubr.msk.bf16.mxu0 %vm4048_vm0, %v4047_v1 }
 0x5b2   :  { %v765_v43 = vmul.f32 %v3826_v38, %v3822_v32 }
 0x5b4   :  { %v767_v44 = vpack.c.bf16 %v765_v43, %v765_v43  ;;  %v3682_v43 = vld [vmem:[#allocation7 + $0x30] sm:$0xff]  }
 0x5b6   :  { %3451 = vmatmul.mubr.msk.bf16.vlgmr.msra.gmra.mxu1 %vm744_vm7, %v767_v44  ;;  %v3683_v44 = vld [vmem:[#allocation7 + $0x28] sm:$0xff]  }
 0x5b7   :  { %3455 = vmatpush3.bf16.msra.mxu1 %v820_v45  ;;  %3456 = vmatprep.mubr.msk.bf16.mxu1 %vm4048_vm0, %v4047_v1  ;;  %v3684_v45 = vld [vmem:[#allocation7 + $0x20] sm:$0xff]  }
 0x5b8   :  { %3466 = vmatprep.subr.bf16.mxu1 %v4047_v1 }
 0x5b9   :  { %v3828_v46 = vpop.eup %3827 }
 0x5ba   :  { %v766_v47 = vmul.f32 %v3828_v46, %v3824_v16  ;;  %v3685_v46 = vld [vmem:[#allocation7 + $0x18] sm:$0xff]  }
 0x5bc   :  { %v768_v49 = vpack.c.bf16 %v766_v47, %v766_v47  ;;  %v3686_v47 = vld [vmem:[#allocation7 + $0x10] sm:$0xff]  }
 0x5be   :  { %3457 = vmatmul.mubr.msk.bf16.vlgmr.msra.gmra.mxu1 %vm744_vm7, %v768_v49 }
 0x5bf   :  { %3467 = vmatpush3.bf16.xpose.msra.mxu1 %v924_v51  ;;  %3468 = vmatprep.mubr.msk.bf16.mxu1 %vm4048_vm0, %v4047_v1 }
 0x5c0   :  { %3478 = vmatprep.subr.bf16.mxu1 %v4047_v1 }
 0x5c6   :  { %3469 = vmatmul.mubr.msk.bf16.vlgmr.msra.gmra.mxu1 %vm647_vm5, %v916_v39 }
 0x5c7   :  { %3480 = vmatprep.mubr.msk.bf16.mxu1 %vm4048_vm0, %v4047_v1 }
 0x670   :  { %v908_v52 = vpop.f32.mrf.mxu0 }
 0x671   :  { %v966_v53 = vmul.f32 0.125, %v908_v52 }
 0x672   :  { %v3464_v54 = vpop.f32.mrf.mxu0 }
 0x673   :  { %v968_v55 = vadd.f32 %v966_v53, %v4312_v63  ;;  %v3688_v53 = vld [vmem:[#allocation7] sm:$0xff]  }
 0x674   :  { %v911_v56 = vpop.f32.mrf.mxu0 }
 0x675   :  { %v970_v57 = vsel %vm744_vm7, %v968_v55, -inf }
 0x676   :  { %v4351_v58 = vpop.f32.mrf.mxu1  ;;  %971 = vmax.xlane.f32.xlu0 %v970_v57  ;;  %v3465_v59 = vpop.f32.mrf.mxu0 }
 0x678   :  { %v3452_v60 = vpop.f32.mrf.mxu1 }
 0x67a   :  { %v813_v61 = vpop.f32.mrf.mxu1 }
 0x67c   :  { %v3453_v62 = vpop.f32.mrf.mxu1 }
 0x67e   :  { %v4353_v2 = vpop.f32.mrf.mxu1 }
 0x680   :  { %v3458_v3 = vpop.f32.mrf.mxu1 }
 0x682   :  { %v859_v4 = vpop.f32.mrf.mxu1 }
 0x684   :  { %v3459_v5 = vpop.f32.mrf.mxu1 }
 0x686   :  { %v960_v6 = vpop.f32.mrf.mxu1 }
 0x687   :  { %v967_v7 = vmul.f32 0.125, %v960_v6  ;;  %v3125_v6 = vld [vmem:[%s4597_s10] ss:$0 sm:$0xff] }
 0x688   :  { %v3470_v8 = vpop.f32.mrf.mxu1 }
 0x689   :  { %v969_v9 = vadd.f32 %v967_v7, %v4317_v11 }
 0x68a   :  { %v963_v10 = vpop.f32.mrf.mxu1 }
 0x68b   :  { %v973_v12 = vsel %vm744_vm7, %v969_v9, -inf }
 0x68c   :  { %974 = vmax.xlane.f32.xlu1 %v973_v12  ;;  %v3471_v13 = vpop.f32.mrf.mxu1 }
 0x69d   :  { %995 = vrot.lane.b32.xlu1 %v4299_v50, %s4038_s1 }
 0x6ff   :  { %v972_v14 = vpop.xlane.xlu0 %971 }
 0x700   :  { %v976_v15 = vsub.f32 %v968_v55, %v972_v14 }
 0x702   :  { %v978_v17 = vmul.f32 1.442695, %v976_v15  ;;  %v3689_v15 = vld [vmem:[#allocation9 + $0x70] ss:$8 sps:$4 sm:$0xff]  }
 0x704   :  { %3829 = vpow2.f32 %v978_v17 }
 0x711   :  { %v3830_v18 = vpop.eup %3829 }
 0x712   :  { %v982_v19 = vsel %vm744_vm7, %v3830_v18, 0.0 }
 0x713   :  { %983 = vadd.xlane.f32.xlu0 %v982_v19 }
 0x715   :  { %v975_v20 = vpop.xlane.xlu1 %974 }
 0x716   :  { %v977_v23 = vsub.f32 %v969_v9, %v975_v20 }
 0x718   :  { %v980_v26 = vmul.f32 1.442695, %v977_v23 }
 0x719   :  { %v996_v28 = vpop.permute.xlu1 %995 }
 0x71a   :  { %3831 = vpow2.f32 %v980_v26  ;;  %v1001_v29 = vsel %vm772_vm6, %v996_v28, 0 }
 0x71b   :  { %3473 = vmatpush3.bf16.msra.mxu0 %v1001_v29  ;;  %v3694_v29 = vld [vmem:[#allocation9 + $0x64] ss:$8 sps:$4 sm:$0xff]  }
 0x71c   :  { %3484 = vmatprep.subr.bf16.mxu0 %v4047_v1 }
 0x727   :  { %v3832_v30 = vpop.eup %3831 }
 0x728   :  { %v985_v50 = vsel %vm744_vm7, %v3832_v30, 0.0 }
 0x729   :  { %986 = vadd.xlane.f32.xlu0 %v985_v50  ;;  %v3695_v50 = vld [vmem:[#allocation9 + $0x50] ss:$8 sps:$4 sm:$0xff]  }
 0x73f   :  { %1044 = vrot.lane.b32.xlu0 %v646_v42, %s4038_s1  ;;  %v3681_v42 = vld [vmem:[#allocation7 + $0x38] sm:$0xff]  }
 0x79c   :  { %v984_v32 = vpop.xlane.xlu0 %983 }
 0x79d   :  { %3833 = vrcp.f32 %v984_v32  ;;  %v3698_v32 = vld [vmem:[#allocation9 + $0x40] ss:$8 sps:$4 sm:$0xff]  }
 0x7aa   :  { %v3834_v33 = vpop.eup %3833 }
 0x7ab   :  { %v990_v16 = vmul.f32 %v3834_v33, %v3830_v18  ;;  %v3700_v33 = vld [vmem:[#allocation9 + $0x44] ss:$8 sps:$4 sm:$0xff]  }
 0x7ad   :  { %v992_v34 = vpack.c.bf16 %v990_v16, %v990_v16  ;;  %v3703_v16 = vld [vmem:[#allocation9 + $0x34] ss:$8 sps:$4 sm:$0xff]  }
 0x7af   :  { %3475 = vmatmul.mubr.msk.bf16.vlgmr.msra.gmra.mxu0 %vm744_vm7, %v992_v34  ;;  %v3701_v34 = vld [vmem:[#allocation9 + $0x30] ss:$8 sps:$4 sm:$0xff]  }
 0x7b0   :  { %3500 = vmatprep.mubr.msk.bf16.mxu0 %vm4048_vm0, %v4047_v1  ;;  %3485 = vmatpush3.bf16.msra.mxu0 %v3681_v42 }
 0x7b1   :  { %3486 = vmatprep.subr.bf16.mxu0 %v4047_v1 }
 0x7b2   :  { %v987_v35 = vpop.xlane.xlu0 %986 }
 0x7b3   :  { %3835 = vrcp.f32 %v987_v35  ;;  %v3706_v35 = vld [vmem:[#allocation9 + $0x24] ss:$8 sps:$4 sm:$0xff]  }
 0x7b4   :  { %3487 = vmatpush3.bf16.msra.mxu0 %v3682_v43 }
 0x7b5   :  { %3488 = vmatprep.subr.bf16.mxu0 %v4047_v1 }
 0x7b6   :  { %v1045_v36 = vpop.permute.xlu0 %1044 }
 0x7b7   :  { %v1050_v37 = vsel %vm772_vm6, %v1045_v36, 0  ;;  %v3704_v36 = vld [vmem:[#allocation9 + $0x20] ss:$8 sps:$4 sm:$0xff]  }
 0x7b8   :  { %3479 = vmatpush3.bf16.msra.mxu1 %v1050_v37  ;;  %3489 = vmatpush3.bf16.msra.mxu0 %v3683_v44  ;;  %v3709_v37 = vld [vmem:[#allocation9 + $0x14] ss:$8 sps:$4 sm:$0xff]  }
 0x7b9   :  { %3490 = vmatprep.subr.bf16.mxu0 %v4047_v1 }
 0x7bc   :  { %3491 = vmatpush3.bf16.msra.mxu0 %v3684_v45 }
 0x7bd   :  { %3492 = vmatprep.subr.bf16.mxu0 %v4047_v1 }
 0x7c0   :  { %v3836_v40 = vpop.eup %3835  ;;  %3493 = vmatpush3.bf16.msra.mxu0 %v3685_v46 }
 0x7c1   :  { %v991_v41 = vmul.f32 %v3836_v40, %v3832_v30  ;;  %3494 = vmatprep.subr.bf16.mxu0 %v4047_v1  ;;  %v3692_v30 = vld [vmem:[#allocation9 + $0x60] ss:$8 sps:$4 sm:$0xff]   ;;  %v3707_v40 = vld [vmem:[#allocation9 + $0x10] ss:$8 sps:$4 sm:$0xff]  }
 0x7c3   :  { %v993_v38 = vpack.c.bf16 %v991_v41, %v991_v41  ;;  %v3712_v41 = vld [vmem:[#allocation9 + $0x4] ss:$8 sps:$4 sm:$0xff]  }
 0x7c4   :  { %3495 = vmatpush3.bf16.msra.mxu0 %v3686_v47 }
 0x7c5   :  { %3481 = vmatmul.mubr.msk.bf16.vlgmr.msra.gmra.mxu1 %vm744_vm7, %v993_v38  ;;  %3496 = vmatprep.subr.bf16.mxu0 %v4047_v1  ;;  %v3710_v38 = vld [vmem:[#allocation9] ss:$8 sps:$4 sm:$0xff]  }
 0x7c6   :  { %1398 = vmatprep.mubr.bf16.mxu1 %v4046_v0 }
 0x7c8   :  { %3497 = vmatpush3.bf16.msra.mxu0 %v3687_v48 }
 0x7c9   :  { %3498 = vmatprep.subr.bf16.mxu0 %v4047_v1 }
 0x7cc   :  { %3499 = vmatpush3.bf16.msra.mxu0 %v3688_v53 }
 0x86f   :  { %v1037_v49 = vpop.f32.mrf.mxu0 }
 0x871   :  { %v3476_v51 = vpop.f32.mrf.mxu0 }
 0x872   :  { %v3134_v51 = vld [vmem:[%s4598_s11] ss:$0 sm:$0xff] }
 0x873   :  { %v1040_v39 = vpop.f32.mrf.mxu0 }
 0x875   :  { %v3477_v52 = vpop.f32.mrf.mxu0 }
 0x885   :  { %v1086_v54 = vpop.f32.mrf.mxu1 }
 0x886   :  { %v3631_v55 = vpack.i.bf16 %v1086_v54, %v1037_v49  ;;  %v3135_v54 = vld [vmem:[%s4599_s12] ss:$0 sm:$0xff] }
 0x887   :  { %v3482_v56 = vpop.f32.mrf.mxu1 }
 0x888   :  { %3632 = vrot.lane.b32.xlu1 %v3631_v55, %s4038_s1 }
 0x889   :  { %v1089_v57 = vpop.f32.mrf.mxu1 }
 0x88b   :  { %v3483_v59 = vpop.f32.mrf.mxu1 }
 0x8fa   :  { %v3633_v60 = vpop.permute.xlu1 %3632 }
 0x8fb   :  { %v3635_v61 = vunpack.i.h.bf16 %v3633_v60  ;;  %v3634_v62 = vunpack.i.l.bf16 %v3633_v60  ;;  %v3713_v60 = vld [vmem:[#allocation10 + $0x78] sm:$0xff]  }
 0x8fc   :  { %3309 = vmatprep.subr.bf16.mxu0 %v3713_v60 }
 0x8fd   :  { %v1101_v3 = vsel %vm647_vm5, %v4353_v2, %v3635_v61  ;;  %v1100_v4 = vsel %vm647_vm5, %v4351_v58, %v3634_v62  ;;  %v3691_v58 = vld [vmem:[#allocation9 + $0x74] ss:$8 sps:$4 sm:$0xff]  }
 0x8fe   :  { %v1102_v5 = vpack.c.bf16 %v1101_v3, %v1100_v4  ;;  %1366 = vmatprep.subr.bf16.mxu1 %v3691_v58  ;;  %v3714_v61 = vld [vmem:[#allocation10 + $0x38] sm:$0xff]   ;;  %v3715_v62 = vld [vmem:[#allocation10 + $0x70] sm:$0xff]   ;;  %v3717_v4 = vld [vmem:[#allocation10 + $0x68] sm:$0xff]  }
 0x8ff   :  { %1367 = vmatpush1.bf16.msra.mxu1 %v3689_v15  ;;  %v3716_v3 = vld [vmem:[#allocation10 + $0x30] sm:$0xff]   ;;  %v3728_v15 = vld [vmem:[#allocation10] sm:$0xff]  }
 0x900   :  { %3501 = vmatmul.mubr.bf16.vlgmr.msra.gmra.mxu0 %v1102_v5  ;;  %1368 = vmatprep.subr.bf16.mxu1 %v3694_v29  ;;  %v3718_v5 = vld [vmem:[#allocation10 + $0x28] sm:$0xff]   ;;  %v1274_v58 = vld [vmem:[%s4601_s14] sm:$0x3] }
 0x901   :  { %3310 = vmatpush3.bf16.msra.mxu0 %v3714_v61 }
 0x902   :  { %3311 = vmatprep.subr.bf16.mxu0 %v3715_v62 }
 0x903   :  { %1369 = vmatpush1.bf16.msra.mxu1 %v3692_v30 }
 0x905   :  { %3312 = vmatpush3.bf16.msra.mxu0 %v3716_v3 }
 0x906   :  { %3313 = vmatprep.subr.bf16.mxu0 %v3717_v4 }
 0x909   :  { %3314 = vmatpush3.bf16.msra.mxu0 %v3718_v5 }
 0x9c0   :  { %v1208_v7 = vpop.f32.mrf.mxu0 }
 0x9c1   :  { %v1209_v8 = vadd.f32 %v3125_v6, %v1208_v7  ;;  %v3720_v7 = vld [vmem:[#allocation10 + $0x20] sm:$0xff]  }
 0x9c2   :  { %v3502_v9 = vpop.f32.mrf.mxu0 }
 0x9c3   :  { %v1215_v10 = vadd.f32 %v1209_v8, %v4257_v21  ;;  %v3721_v8 = vld [vmem:[#allocation10 + $0x58] sm:$0xff]  }
 0x9c4   :  { %v1211_v12 = vpop.f32.mrf.mxu0  ;;  %v3722_v9 = vld [vmem:[#allocation10 + $0x18] sm:$0xff]  }
 0x9c5   :  { %v1212_v13 = vadd.f32 %v3125_v6, %v1211_v12  ;;  %1219 = vadd.xlane.f32.xlu1 %v1215_v10  ;;  %v3719_v6 = vld [vmem:[#allocation10 + $0x60] sm:$0xff]   ;;  %v3724_v12 = vld [vmem:[#allocation10 + $0x10] sm:$0xff]  }
 0x9c6   :  { %v3503_v14 = vpop.f32.mrf.mxu0  ;;  %3315 = vmatprep.subr.bf16.mxu0 %v3719_v6 }
 0x9c7   :  { %v1216_v2 = vadd.f32 %v1212_v13, %v4259_v22  ;;  %v3697_v22 = vld [vmem:[#allocation9 + $0x54] ss:$8 sps:$4 sm:$0xff]   ;;  %3316 = vmatpush3.bf16.msra.mxu0 %v3720_v7  ;;  %v3725_v13 = vld [vmem:[#allocation10 + $0x48] sm:$0xff]  }
 0x9c8   :  { %1370 = vmatprep.subr.bf16.mxu1 %v3697_v22  ;;  %3317 = vmatprep.subr.bf16.mxu0 %v3721_v8  ;;  %v3726_v14 = vld [vmem:[#allocation10 + $0x8] sm:$0xff]  }
 0x9c9   :  { %1221 = vadd.xlane.f32.xlu0 %v1216_v2  ;;  %1371 = vmatpush1.bf16.msra.mxu1 %v3695_v50 }
 0x9ca   :  { %1372 = vmatprep.subr.bf16.mxu1 %v3700_v33 }
 0x9cb   :  { %3318 = vmatpush3.bf16.msra.mxu0 %v3722_v9 }
 0x9cd   :  { %1373 = vmatpush1.bf16.msra.mxu1 %v3698_v32 }
 0x9ce   :  { %1374 = vmatprep.subr.bf16.mxu1 %v3703_v16 }
 0x9d1   :  { %1375 = vmatpush1.bf16.msra.mxu1 %v3701_v34 }
 0x9d2   :  { %1376 = vmatprep.subr.bf16.mxu1 %v3706_v35 }
 0x9d5   :  { %1377 = vmatpush1.bf16.msra.mxu1 %v3704_v36 }
 0x9d6   :  { %1378 = vmatprep.subr.bf16.mxu1 %v3709_v37 }
 0x9d9   :  { %1379 = vmatpush1.bf16.msra.mxu1 %v3707_v40 }
 0x9da   :  { %1380 = vmatprep.subr.bf16.mxu1 %v3712_v41 }
 0x9dd   :  { %1381 = vmatpush1.bf16.msra.mxu1 %v3710_v38 }
 0xa4e   :  { %v1220_v17 = vpop.xlane.xlu1 %1219 }
 0xa4f   :  { %v1223_v18 = vmul.f32 0.0078125, %v1220_v17  ;;  %v1279_v17 = vrot.slane %v1274_v58, %v4279_v31 }
 0xa51   :  { %v1225_v19 = vsub.f32 %v1215_v10, %v1223_v18  ;;  %v3723_v10 = vld [vmem:[#allocation10 + $0x50] sm:$0xff]   ;;  %v1283_v18 = vrot.slane %v1274_v58, %v4271_v25 }
 0xa52   :  { %v1222_v20 = vpop.xlane.xlu0 %1221  ;;  %3319 = vmatprep.subr.bf16.mxu0 %v3723_v10 }
 0xa53   :  { %v1224_v23 = vmul.f32 0.0078125, %v1222_v20  ;;  %v1227_v26 = vmul.f32 %v1225_v19, %v1225_v19  ;;  %3320 = vmatpush3.bf16.msra.mxu0 %v3724_v12 }
 0xa54   :  { %3321 = vmatprep.subr.bf16.mxu0 %v3725_v13  ;;  %v3152_v13 = vld [vmem:[%s4603_s16] ss:$0 sm:$0xff] }
 0xa55   :  { %v1226_v28 = vsub.f32 %v1216_v2, %v1224_v23  ;;  %1229 = vadd.xlane.f32.xlu0 %v1227_v26  ;;  %v3727_v2 = vld [vmem:[#allocation10 + $0x40] sm:$0xff]  }
 0xa57   :  { %v1228_v21 = vmul.f32 %v1226_v28, %v1226_v28  ;;  %3322 = vmatpush3.bf16.msra.mxu0 %v3726_v14 }
 0xa58   :  { %3323 = vmatprep.subr.bf16.mxu0 %v3727_v2 }
 0xa59   :  { %1231 = vadd.xlane.f32.xlu1 %v1228_v21 }
 0xa5b   :  { %3324 = vmatpush3.bf16.msra.mxu0 %v3728_v15 }
 0xa5c   :  { %3504 = vmatprep.subr.bf16.mxu0 %v4047_v1 }
 0xade   :  { %v1230_v42 = vpop.xlane.xlu0 %1229 }
 0xadf   :  { %v1233_v43 = vmul.f32 0.0078125, %v1230_v42 }
 0xae1   :  { %v1235_v44 = vadd.f32 1e-12, %v1233_v43 }
 0xae2   :  { %v1232_v45 = vpop.xlane.xlu1 %1231 }
 0xae3   :  { %3837 = vrsqrt.f32 %v1235_v44  ;;  %v1234_v46 = vmul.f32 0.0078125, %v1232_v45 }
 0xae5   :  { %v1236_v47 = vadd.f32 1e-12, %v1234_v46 }
 0xae7   :  { %3839 = vrsqrt.f32 %v1236_v47 }
 0xaf0   :  { %v3838_v48 = vpop.eup %3837 }
 0xaf1   :  { %v1239_v49 = vmul.f32 %v3838_v48, %v1225_v19 }
 0xaf3   :  { %v1247_v53 = vmul.f32 %v3134_v51, %v1239_v49 }
 0xaf4   :  { %v3840_v39 = vpop.eup %3839 }
 0xaf5   :  { %v1240_v52 = vmul.f32 %v3840_v39, %v1226_v28  ;;  %v4393_v56 = vadd.f32 %v3135_v54, %v1247_v53 }
 0xaf7   :  { %v1248_v55 = vmul.f32 %v3134_v51, %v1240_v52 }
 0xaf9   :  { %v4395_v57 = vadd.f32 %v3135_v54, %v1248_v55 }
 0xafb   :  { %v1257_v59 = vpack.c.bf16 %v4395_v57, %v4393_v56 }
 0xafd   :  { %1399 = vmatmul.mubr.bf16.vlgmr.msra.gmra.mxu1 %v1257_v59 }
 0xafe   :  { %1877 = vmatprep.mubr.bf16.mxu1 %v4046_v0 }
 0xbbd   :  { %v1400_v19 = vpop.f32.mrf.mxu1 }
 0xbbe   :  { %v1401_v20 = vadd.f32 %v1400_v19, %v1279_v17 }
 0xbbf   :  { %v1402_v23 = vpop.f32.mrf.mxu1 }
 0xbc0   :  { %v1409_v26 = vmul.f32 %v1401_v20, %v1401_v20  ;;  %v1403_v28 = vadd.f32 %v1402_v23, %v1283_v18 }
 0xbc1   :  { %v1404_v21 = vpop.f32.mrf.mxu1 }
 0xbc2   :  { %v1413_v29 = vmul.f32 %v1409_v26, %v1401_v20  ;;  %v1410_v30 = vmul.f32 %v1403_v28, %v1403_v28  ;;  %v1405_v22 = vadd.f32 %v1404_v21, %v1279_v17  ;;  %v3729_v26 = vld [vmem:[#allocation6 + $0x168] ss:$12 sps:$4 sm:$0xff]   ;;  %v3732_v21 = vld [vmem:[#allocation6 + $0x170] ss:$12 sps:$4 sm:$0xff]  }
 0xbc3   :  { %v1406_v50 = vpop.f32.mrf.mxu1 }
 0xbc4   :  { %v1417_v32 = vmul.f32 0.044715, %v1413_v29  ;;  %v1414_v33 = vmul.f32 %v1410_v30, %v1403_v28  ;;  %v1411_v16 = vmul.f32 %v1405_v22, %v1405_v22  ;;  %v1407_v34 = vadd.f32 %v1406_v50, %v1283_v18 }
 0xbc6   :  { %v1421_v35 = vadd.f32 %v1417_v32, %v1401_v20  ;;  %v1418_v36 = vmul.f32 0.044715, %v1414_v33  ;;  %v1415_v37 = vmul.f32 %v1411_v16, %v1405_v22  ;;  %v1412_v40 = vmul.f32 %v1407_v34, %v1407_v34  ;;  %v3735_v16 = vld [vmem:[#allocation6 + $0x154] ss:$12 sps:$4 sm:$0xff]  }
 0xbc8   :  { %v1425_v41 = vmul.f32 0.7978846, %v1421_v35  ;;  %v1422_v38 = vadd.f32 %v1418_v36, %v1403_v28  ;;  %v1419_v42 = vmul.f32 0.044715, %v1415_v37  ;;  %v1416_v43 = vmul.f32 %v1412_v40, %v1407_v34  ;;  %v3736_v35 = vld [vmem:[#allocation6 + $0x158] ss:$12 sps:$4 sm:$0xff]  }
 0xbc9   :  { %v3739_v36 = vld [vmem:[#allocation6 + $0x13c] ss:$12 sps:$4 sm:$0xff]   ;;  %v3737_v37 = vld [vmem:[#allocation6 + $0x138] ss:$12 sps:$4 sm:$0xff]   ;;  %v3740_v40 = vld [vmem:[#allocation6 + $0x140] ss:$12 sps:$4 sm:$0xff]  }
 0xbca   :  { %v1426_v44 = vmul.f32 0.7978846, %v1422_v38  ;;  %v1423_v45 = vadd.f32 %v1419_v42, %v1405_v22  ;;  %v1420_v46 = vmul.f32 0.044715, %v1416_v43  ;;  %3841 = vtanh.f32 %v1425_v41  ;;  %v3741_v41 = vld [vmem:[#allocation6 + $0x120] ss:$12 sps:$4 sm:$0xff]  }
 0xbcb   :  { %v3743_v38 = vld [vmem:[#allocation6 + $0x124] ss:$12 sps:$4 sm:$0xff]   ;;  %v3744_v42 = vld [vmem:[#allocation6 + $0x128] ss:$12 sps:$4 sm:$0xff]   ;;  %v3747_v43 = vld [vmem:[#allocation6 + $0x10c] ss:$12 sps:$4 sm:$0xff]  }
 0xbcc   :  { %3843 = vtanh.f32 %v1426_v44  ;;  %v1427_v47 = vmul.f32 0.7978846, %v1423_v45  ;;  %v1424_v48 = vadd.f32 %v1420_v46, %v1407_v34  ;;  %v3745_v44 = vld [vmem:[#allocation6 + $0x108] ss:$12 sps:$4 sm:$0xff]   ;;  %v3748_v45 = vld [vmem:[#allocation6 + $0x110] ss:$12 sps:$4 sm:$0xff]  }
 0xbcd   :  { %v3751_v46 = vld [vmem:[#allocation6 + $0xf4] ss:$12 sps:$4 sm:$0xff]  }
 0xbce   :  { %3845 = vtanh.f32 %v1427_v47  ;;  %v1428_v49 = vmul.f32 0.7978846, %v1424_v48  ;;  %v3749_v47 = vld [vmem:[#allocation6 + $0xf0] ss:$12 sps:$4 sm:$0xff]   ;;  %v3752_v48 = vld [vmem:[#allocation6 + $0xf8] ss:$12 sps:$4 sm:$0xff]  }
 0xbd0   :  { %3847 = vtanh.f32 %v1428_v49  ;;  %v3755_v49 = vld [vmem:[#allocation6 + $0xdc] ss:$12 sps:$4 sm:$0xff]  }
 0xbd7   :  { %v3842_v51 = vpop.eup %3841 }
 0xbd8   :  { %v1433_v54 = vadd.f32 1.0, %v3842_v51  ;;  %v3753_v51 = vld [vmem:[#allocation6 + $0xd8] ss:$12 sps:$4 sm:$0xff]  }
 0xbd9   :  { %v3844_v39 = vpop.eup %3843 }
 0xbda   :  { %v1434_v52 = vadd.f32 1.0, %v3844_v39  ;;  %v1437_v3 = vmul.f32 0.5, %v1433_v54  ;;  %v3756_v39 = vld [vmem:[#allocation6 + $0xe0] ss:$12 sps:$4 sm:$0xff]   ;;  %v3760_v54 = vld [vmem:[#allocation6 + $0xc8] ss:$12 sps:$4 sm:$0xff]  }
 0xbdb   :  { %v3846_v53 = vpop.eup %3845 }
 0xbdc   :  { %v1435_v55 = vadd.f32 1.0, %v3846_v53  ;;  %v1438_v62 = vmul.f32 0.5, %v1434_v52  ;;  %v1441_v8 = vmul.f32 %v1437_v3, %v1401_v20  ;;  %v3759_v52 = vld [vmem:[#allocation6 + $0xc4] ss:$12 sps:$4 sm:$0xff]   ;;  %v3757_v53 = vld [vmem:[#allocation6 + $0xc0] ss:$12 sps:$4 sm:$0xff]  }
 0xbdd   :  { %v3848_v59 = vpop.eup %3847 }
 0xbde   :  { %v1439_v60 = vmul.f32 0.5, %v1435_v55  ;;  %v1436_v61 = vadd.f32 1.0, %v3848_v59  ;;  %v1442_v6 = vmul.f32 %v1438_v62, %v1403_v28  ;;  %v3731_v28 = vld [vmem:[#allocation6 + $0x16c] ss:$12 sps:$4 sm:$0xff]  }
 0xbdf   :  { %1845 = vmatprep.subr.bf16.mxu1 %v3731_v28 }
 0xbe0   :  { %v1440_v4 = vmul.f32 0.5, %v1436_v61  ;;  %v1443_v5 = vmul.f32 %v1439_v60, %v1405_v22  ;;  %1846 = vmatpush1.bf16.msra.mxu1 %v3729_v26 }
 0xbe1   :  { %1847 = vmatprep.subr.bf16.mxu1 %v3735_v16 }
 0xbe2   :  { %v1444_v7 = vmul.f32 %v1440_v4, %v1407_v34  ;;  %v1445_v10 = vpack.c.bf16 %v1443_v5, %v1441_v8  ;;  %v3733_v34 = vld [vmem:[#allocation6 + $0x150] ss:$12 sps:$4 sm:$0xff]  }
 0xbe4   :  { %v1446_v9 = vpack.c.bf16 %v1444_v7, %v1442_v6  ;;  %1848 = vmatpush1.bf16.msra.mxu1 %v3733_v34  ;;  %v3169_v6 = vld [vmem:[%s4604_s17] ss:$0 sm:$0xff] }
 0xbe5   :  { %1849 = vmatprep.subr.bf16.mxu1 %v3739_v36 }
 0xbe6   :  { %1614 = vmatprep.mubr.bf16.mxu0 %v1446_v9 }
 0xbe7   :  { %1615 = vmatmul.mubr.bf16.vlgmr.msra.gmra.mxu0 %v1445_v10  ;;  %v3170_v10 = vld [vmem:[%s4605_s18] ss:$0 sm:$0xff] }
 0xbe8   :  { %3520 = vmatprep.mubr.msk.bf16.mxu0 %vm4048_vm0, %v4047_v1  ;;  %3505 = vmatpush3.bf16.msra.mxu0 %v3732_v21 }
 0xbe9   :  { %3506 = vmatprep.subr.bf16.mxu0 %v4047_v1  ;;  %1850 = vmatpush1.bf16.msra.mxu1 %v3737_v37 }
 0xbea   :  { %1851 = vmatprep.subr.bf16.mxu1 %v3743_v38 }
 0xbec   :  { %3507 = vmatpush3.bf16.msra.mxu0 %v3736_v35 }
 0xbed   :  { %3508 = vmatprep.subr.bf16.mxu0 %v4047_v1  ;;  %1852 = vmatpush1.bf16.msra.mxu1 %v3741_v41 }
 0xbee   :  { %1853 = vmatprep.subr.bf16.mxu1 %v3747_v43 }
 0xbf0   :  { %3509 = vmatpush3.bf16.msra.mxu0 %v3740_v40 }
 0xbf1   :  { %3510 = vmatprep.subr.bf16.mxu0 %v4047_v1  ;;  %1854 = vmatpush1.bf16.msra.mxu1 %v3745_v44 }
 0xbf2   :  { %1855 = vmatprep.subr.bf16.mxu1 %v3751_v46 }
 0xbf4   :  { %3511 = vmatpush3.bf16.msra.mxu0 %v3744_v42 }
 0xbf5   :  { %3512 = vmatprep.subr.bf16.mxu0 %v4047_v1  ;;  %1856 = vmatpush1.bf16.msra.mxu1 %v3749_v47 }
 0xbf6   :  { %1857 = vmatprep.subr.bf16.mxu1 %v3755_v49 }
 0xbf8   :  { %3513 = vmatpush3.bf16.msra.mxu0 %v3748_v45 }
 0xbf9   :  { %3514 = vmatprep.subr.bf16.mxu0 %v4047_v1  ;;  %1858 = vmatpush1.bf16.msra.mxu1 %v3753_v51 }
 0xbfa   :  { %1859 = vmatprep.subr.bf16.mxu1 %v3759_v52 }
 0xbfc   :  { %3515 = vmatpush3.bf16.msra.mxu0 %v3752_v48 }
 0xbfd   :  { %3516 = vmatprep.subr.bf16.mxu0 %v4047_v1  ;;  %1860 = vmatpush1.bf16.msra.mxu1 %v3757_v53 }
 0xbfe   :  { %3524 = vmatprep.subr.bf16.mxu1 %v4047_v1 }
 0xc00   :  { %3517 = vmatpush3.bf16.msra.mxu0 %v3756_v39 }
 0xc01   :  { %3518 = vmatprep.subr.bf16.mxu0 %v4047_v1 }
 0xc04   :  { %3519 = vmatpush3.bf16.msra.mxu0 %v3760_v54 }
 0xc05   :  { %3548 = vmatprep.subr.bf16.mxu0 %v4047_v1 }
 0xca7   :  { %v3325_v12 = vpop.f32.mrf.mxu0 }
 0xca9   :  { %v3326_v14 = vpop.f32.mrf.mxu0 }
 0xcaa   :  { %v3327_v2 = vadd.f32 %v3326_v14, %v3325_v12 }
 0xcab   :  { %v3328_v15 = vpop.f32.mrf.mxu0 }
 0xcac   :  { %v1617_v58 = vadd.f32 %v3327_v2, %v3152_v13 }
 0xcad   :  { %v3329_v17 = vpop.f32.mrf.mxu0 }
 0xcae   :  { %v3330_v18 = vadd.f32 %v3329_v17, %v3328_v15  ;;  %v1623_v19 = vadd.f32 %v1617_v58, %v4393_v56  ;;  %v3171_v15 = vld [vmem:[%s4595_s8 + $0x3] sm:$0x7] }
 0xcaf   :  { %v1709_v58 = vrot.slane %v3171_v15, %v4271_v25 }
 0xcb0   :  { %v1620_v20 = vadd.f32 %v3330_v18, %v3152_v13  ;;  %1627 = vadd.xlane.f32.xlu0 %v1623_v19 }
 0xcb2   :  { %v1624_v23 = vadd.f32 %v1620_v20, %v4395_v57 }
 0xcb4   :  { %1629 = vadd.xlane.f32.xlu1 %v1624_v23 }
 0xd39   :  { %v1628_v29 = vpop.xlane.xlu0 %1627 }
 0xd3a   :  { %v1631_v30 = vmul.f32 0.0078125, %v1628_v29  ;;  %v1705_v29 = vrot.slane %v3171_v15, %v4279_v31 }
 0xd3c   :  { %v4414_v22 = vsub.f32 %v1623_v19, %v1631_v30 }
 0xd3d   :  { %v1630_v50 = vpop.xlane.xlu1 %1629 }
 0xd3e   :  { %v1632_v32 = vmul.f32 0.0078125, %v1630_v50  ;;  %v1635_v56 = vmul.f32 %v4414_v22, %v4414_v22 }
 0xd40   :  { %v4418_v33 = vsub.f32 %v1624_v23, %v1632_v32  ;;  %1637 = vadd.xlane.f32.xlu0 %v1635_v56  ;;  %v1713_v23 = vrot.slane %v3171_v15, %v424_v27 }
 0xd42   :  { %v1636_v57 = vmul.f32 %v4418_v33, %v4418_v33 }
 0xd44   :  { %1639 = vadd.xlane.f32.xlu1 %v1636_v57 }
 0xdc9   :  { %v1638_v55 = vpop.xlane.xlu0 %1637 }
 0xdca   :  { %v1641_v59 = vmul.f32 0.0078125, %v1638_v55 }
 0xdcc   :  { %v1643_v60 = vadd.f32 1e-12, %v1641_v59 }
 0xdcd   :  { %v1640_v61 = vpop.xlane.xlu1 %1639 }
 0xdce   :  { %3849 = vrsqrt.f32 %v1643_v60  ;;  %v1642_v62 = vmul.f32 0.0078125, %v1640_v61 }
 0xdd0   :  { %v1644_v3 = vadd.f32 1e-12, %v1642_v62 }
 0xdd2   :  { %3851 = vrsqrt.f32 %v1644_v3 }
 0xddb   :  { %v3850_v4 = vpop.eup %3849 }
 0xddc   :  { %v1647_v5 = vmul.f32 %v3850_v4, %v4414_v22 }
 0xdde   :  { %v1655_v9 = vmul.f32 %v3169_v6, %v1647_v5 }
 0xddf   :  { %v3852_v7 = vpop.eup %3851 }
 0xde0   :  { %v1648_v8 = vmul.f32 %v3852_v7, %v4418_v33  ;;  %v4438_v13 = vadd.f32 %v3170_v10, %v1655_v9 }
 0xde2   :  { %v1656_v12 = vmul.f32 %v3169_v6, %v1648_v8 }
 0xde4   :  { %v4440_v14 = vadd.f32 %v3170_v10, %v1656_v12 }
 0xde6   :  { %v1665_v2 = vpack.c.bf16 %v4440_v14, %v4438_v13 }
 0xde8   :  { %1878 = vmatmul.mubr.bf16.vlgmr.msra.gmra.mxu1 %v1665_v2  ;;  %3521 = vmatmul.mubr.bf16.vlgmr.msra.gmra.mxu0 %v1665_v2 }
 0xde9   :  { %3526 = vmatprep.mubr.msk.bf16.mxu1 %vm4048_vm0, %v4047_v1  ;;  %3550 = vmatprep.mubr.msk.bf16.mxu0 %vm4048_vm0, %v4047_v1 }
 0xea8   :  { %v1879_v17 = vpop.f32.mrf.mxu1  ;;  %v1922_v18 = vpop.f32.mrf.mxu0 }
 0xea9   :  { %v1880_v57 = vadd.f32 %v1879_v17, %v1705_v29  ;;  %v1923_v27 = vadd.f32 %v1922_v18, %v1713_v23 }
 0xeaa   :  { %v1881_v19 = vpop.f32.mrf.mxu1  ;;  %v3522_v20 = vpop.f32.mrf.mxu0 }
 0xeab   :  { %v1882_v26 = vadd.f32 %v1881_v19, %v1709_v58  ;;  %v1929_v24 = vpack.c.bf16 %v1880_v57, %v1880_v57  ;;  %v4464_v36 = vpack.c.bf16 %v1923_v27, %v1923_v27 }
 0xeac   :  { %v1883_v28 = vpop.f32.mrf.mxu1  ;;  %v1925_v21 = vpop.f32.mrf.mxu0 }
 0xead   :  { %v1931_v30 = vpack.c.bf16 %v1882_v26, %v1882_v26  ;;  %v4455_v22 = vadd.f32 %v1925_v21, %v1713_v23  ;;  %v1884_v35 = vadd.f32 %v1883_v28, %v1705_v29  ;;  %v2059_v40 = vsel %vm772_vm6, %v4464_v36, 0 }
 0xeae   :  { %v1885_v50 = vpop.f32.mrf.mxu1  ;;  %v3523_v32 = vpop.f32.mrf.mxu0 }
 0xeaf   :  { %v1939_v56 = vsel %vm647_vm5, %v1931_v30, 0  ;;  %v1886_v33 = vadd.f32 %v1885_v50, %v1709_v58  ;;  %v1930_v37 = vpack.c.bf16 %v1884_v35, %v1884_v35  ;;  %v1934_v15 = vpack.c.bf16 %v4455_v22, %v4455_v22 }
 0xeb0   :  { %3525 = vmatpush3.bf16.xpose.msra.mxu1 %v1939_v56 }
 0xeb1   :  { %3530 = vmatprep.subr.bf16.mxu1 %v4047_v1  ;;  %v1932_v16 = vpack.c.bf16 %v1886_v33, %v1886_v33  ;;  %v2105_v19 = vsel %vm772_vm6, %v1934_v15, 0 }
 0xeb3   :  { %v1985_v34 = vsel %vm647_vm5, %v1932_v16, 0 }
 0xeb7   :  { %3527 = vmatmul.mubr.msk.bf16.vlgmr.msra.gmra.mxu1 %vm647_vm5, %v1929_v24 }
 0xeb8   :  { %3531 = vmatpush3.bf16.xpose.msra.mxu1 %v1985_v34  ;;  %3532 = vmatprep.mubr.msk.bf16.mxu1 %vm4048_vm0, %v4047_v1 }
 0xeb9   :  { %3536 = vmatprep.subr.bf16.mxu1 %v4047_v1 }
 0xebf   :  { %3533 = vmatmul.mubr.msk.bf16.vlgmr.msra.gmra.mxu1 %vm647_vm5, %v1930_v37 }
 0xec0   :  { %3537 = vmatpush3.bf16.msra.mxu1 %v2059_v40  ;;  %3538 = vmatprep.mubr.msk.bf16.mxu1 %vm4048_vm0, %v4047_v1 }
 0xec1   :  { %3542 = vmatprep.subr.bf16.mxu1 %v4047_v1 }
 0xf77   :  { %v1975_v41 = vpop.f32.mrf.mxu1 }
 0xf78   :  { %v2027_v38 = vmul.f32 0.125, %v1975_v41 }
 0xf79   :  { %v3528_v42 = vpop.f32.mrf.mxu1 }
 0xf7a   :  { %v2029_v43 = vadd.f32 %v2027_v38, %v4312_v63 }
 0xf7b   :  { %v1978_v44 = vpop.f32.mrf.mxu1 }
 0xf7c   :  { %v2031_v45 = vsel %vm744_vm7, %v2029_v43, -inf }
 0xf7d   :  { %2032 = vmax.xlane.f32.xlu0 %v2031_v45  ;;  %v3529_v46 = vpop.f32.mrf.mxu1 }
 0xf7f   :  { %v2021_v47 = vpop.f32.mrf.mxu1 }
 0xf80   :  { %v2028_v48 = vmul.f32 0.125, %v2021_v47 }
 0xf81   :  { %v3534_v49 = vpop.f32.mrf.mxu1 }
 0xf82   :  { %v2030_v51 = vadd.f32 %v2028_v48, %v4317_v11 }
 0xf83   :  { %v2024_v39 = vpop.f32.mrf.mxu1 }
 0xf84   :  { %v2034_v52 = vsel %vm744_vm7, %v2030_v51, -inf }
 0xf85   :  { %2035 = vmax.xlane.f32.xlu1 %v2034_v52  ;;  %v3535_v53 = vpop.f32.mrf.mxu1 }
0x1006   :  { %v2033_v54 = vpop.xlane.xlu0 %2032 }
0x1007   :  { %v2037_v55 = vsub.f32 %v2029_v43, %v2033_v54 }
0x1009   :  { %v2039_v59 = vmul.f32 1.442695, %v2037_v55 }
0x100b   :  { %3853 = vpow2.f32 %v2039_v59 }
0x100e   :  { %v2036_v60 = vpop.xlane.xlu1 %2035 }
0x100f   :  { %v2038_v61 = vsub.f32 %v2030_v51, %v2036_v60 }
0x1011   :  { %v2041_v62 = vmul.f32 1.442695, %v2038_v61 }
0x1013   :  { %3855 = vpow2.f32 %v2041_v62 }
0x1018   :  { %v3854_v3 = vpop.eup %3853 }
0x1019   :  { %v2043_v4 = vsel %vm744_vm7, %v3854_v3, 0.0 }
0x101a   :  { %2044 = vadd.xlane.f32.xlu0 %v2043_v4 }
0x1020   :  { %v3856_v5 = vpop.eup %3855 }
0x1021   :  { %v2046_v6 = vsel %vm744_vm7, %v3856_v5, 0.0 }
0x1022   :  { %2047 = vadd.xlane.f32.xlu1 %v2046_v6 }
0x1030   :  { %2151 = vrot.lane.b32.xlu0 %v1931_v30, %s4038_s1 }
0x1033   :  { %2203 = vrot.lane.b32.xlu1 %v1932_v16, %s4038_s1 }
0x1034   :  { %2200 = vrot.lane.b32.xlu0 %v1930_v37, %s4038_s1 }
0x1037   :  { %2148 = vrot.lane.b32.xlu1 %v1929_v24, %s4038_s1 }
0x10a3   :  { %v2045_v7 = vpop.xlane.xlu0 %2044 }
0x10a4   :  { %3857 = vrcp.f32 %v2045_v7 }
0x10a7   :  { %v2152_v8 = vpop.permute.xlu0 %2151 }
0x10a8   :  { %v2157_v9 = vsel %vm647_vm5, %v2152_v8, 0 }
0x10a9   :  { %3549 = vmatpush3.bf16.xpose.msra.mxu0 %v2157_v9  ;;  %v3761_v9 = vld [vmem:[#allocation7 + $0x78] sm:$0xff]  }
0x10aa   :  { %3560 = vmatprep.subr.bf16.mxu0 %v4047_v1 }
0x10ab   :  { %v2048_v10 = vpop.xlane.xlu1 %2047  ;;  %v2201_v21 = vpop.permute.xlu0 %2200 }
0x10ac   :  { %3859 = vrcp.f32 %v2048_v10  ;;  %v3762_v10 = vld [vmem:[#allocation7 + $0x70] sm:$0xff]  }
0x10af   :  { %v2204_v12 = vpop.permute.xlu1 %2203 }
0x10b0   :  { %v2209_v28 = vsel %vm647_vm5, %v2204_v12, 0  ;;  %v3763_v12 = vld [vmem:[#allocation7 + $0x68] sm:$0xff]  }
0x10b1   :  { %v3858_v2 = vpop.eup %3857 }
0x10b2   :  { %v2051_v58 = vmul.f32 %v3858_v2, %v3854_v3  ;;  %v3764_v2 = vld [vmem:[#allocation7 + $0x60] sm:$0xff]  }
0x10b3   :  { %v2149_v17 = vpop.permute.xlu1 %2148 }
0x10b4   :  { %3551 = vmatmul.mubr.msk.bf16.vlgmr.msra.gmra.mxu0 %vm647_vm5, %v2149_v17  ;;  %v2053_v18 = vpack.c.bf16 %v2051_v58, %v2051_v58  ;;  %v3766_v58 = vld [vmem:[#allocation7 + $0x50] sm:$0xff]  }
0x10b5   :  { %3562 = vmatprep.mubr.msk.bf16.mxu0 %vm4048_vm0, %v4047_v1 }
0x10b6   :  { %3539 = vmatmul.mubr.msk.bf16.vlgmr.msra.gmra.mxu1 %vm744_vm7, %v2053_v18 }
0x10b7   :  { %3543 = vmatpush3.bf16.msra.mxu1 %v2105_v19  ;;  %3544 = vmatprep.mubr.msk.bf16.mxu1 %vm4048_vm0, %v4047_v1 }
0x10b8   :  { %3554 = vmatprep.subr.bf16.mxu1 %v4047_v1 }
0x10b9   :  { %v3860_v20 = vpop.eup %3859 }
0x10ba   :  { %v2052_v23 = vmul.f32 %v3860_v20, %v3856_v5 }
0x10bc   :  { %v2054_v26 = vpack.c.bf16 %v2052_v23, %v2052_v23  ;;  %v3768_v23 = vld [vmem:[#allocation7 + $0x40] sm:$0xff]  }
0x10be   :  { %3545 = vmatmul.mubr.msk.bf16.vlgmr.msra.gmra.mxu1 %vm744_vm7, %v2054_v26 }
0x10bf   :  { %3555 = vmatpush3.bf16.xpose.msra.mxu1 %v2209_v28  ;;  %3556 = vmatprep.mubr.msk.bf16.mxu1 %vm4048_vm0, %v4047_v1 }
0x10c0   :  { %3566 = vmatprep.subr.bf16.mxu1 %v4047_v1 }
0x10c6   :  { %3557 = vmatmul.mubr.msk.bf16.vlgmr.msra.gmra.mxu1 %vm647_vm5, %v2201_v21 }
0x10c7   :  { %3568 = vmatprep.mubr.msk.bf16.mxu1 %vm4048_vm0, %v4047_v1 }
0x1174   :  { %v2193_v29 = vpop.f32.mrf.mxu0 }
0x1175   :  { %v2251_v30 = vmul.f32 0.125, %v2193_v29 }
0x1176   :  { %v4502_v22 = vpop.f32.mrf.mxu1  ;;  %v3552_v50 = vpop.f32.mrf.mxu0 }
0x1177   :  { %v2253_v32 = vadd.f32 %v2251_v30, %v4312_v63 }
0x1178   :  { %v3540_v56 = vpop.f32.mrf.mxu1  ;;  %v2196_v33 = vpop.f32.mrf.mxu0 }
0x1179   :  { %v2255_v57 = vsel %vm744_vm7, %v2253_v32, -inf }
0x117a   :  { %2256 = vmax.xlane.f32.xlu1 %v2255_v57  ;;  %v2098_v16 = vpop.f32.mrf.mxu1  ;;  %v3553_v24 = vpop.f32.mrf.mxu0 }
0x117b   :  { %v3205_v24 = vld [vmem:[%s4597_s10 + $0x1] ss:$0 sm:$0xff] }
0x117c   :  { %v3541_v27 = vpop.f32.mrf.mxu1 }
0x117e   :  { %v4506_v34 = vpop.f32.mrf.mxu1 }
0x1180   :  { %v3546_v35 = vpop.f32.mrf.mxu1 }
0x1182   :  { %v2144_v37 = vpop.f32.mrf.mxu1 }
0x1184   :  { %v3547_v40 = vpop.f32.mrf.mxu1 }
0x1186   :  { %v2245_v41 = vpop.f32.mrf.mxu1 }
0x1187   :  { %v2252_v38 = vmul.f32 0.125, %v2245_v41 }
0x1188   :  { %v3558_v42 = vpop.f32.mrf.mxu1 }
0x1189   :  { %v2254_v43 = vadd.f32 %v2252_v38, %v4317_v11 }
0x118a   :  { %v2248_v44 = vpop.f32.mrf.mxu1 }
0x118b   :  { %v2258_v63 = vsel %vm744_vm7, %v2254_v43, -inf }
0x118c   :  { %2259 = vmax.xlane.f32.xlu0 %v2258_v63  ;;  %v3559_v45 = vpop.f32.mrf.mxu1 }
0x1203   :  { %v2257_v46 = vpop.xlane.xlu1 %2256 }
0x1204   :  { %v2261_v47 = vsub.f32 %v2253_v32, %v2257_v46 }
0x1206   :  { %v2263_v48 = vmul.f32 1.442695, %v2261_v47 }
0x1208   :  { %3861 = vpow2.f32 %v2263_v48 }
0x1215   :  { %v3862_v49 = vpop.eup %3861  ;;  %v2260_v51 = vpop.xlane.xlu0 %2259 }
0x1216   :  { %v2262_v39 = vsub.f32 %v2254_v43, %v2260_v51  ;;  %v2267_v52 = vsel %vm744_vm7, %v3862_v49, 0.0  ;;  %v3769_v43 = vld [vmem:[#allocation9 + $0xf0] ss:$8 sps:$4 sm:$0xff]   ;;  %v3774_v51 = vld [vmem:[#allocation9 + $0xe4] ss:$8 sps:$4 sm:$0xff]  }
0x1217   :  { %2268 = vadd.xlane.f32.xlu0 %v2267_v52  ;;  %v3775_v52 = vld [vmem:[#allocation9 + $0xd0] ss:$8 sps:$4 sm:$0xff]  }
0x1218   :  { %v2265_v53 = vmul.f32 1.442695, %v2262_v39  ;;  %v3772_v39 = vld [vmem:[#allocation9 + $0xe0] ss:$8 sps:$4 sm:$0xff]  }
0x121a   :  { %3863 = vpow2.f32 %v2265_v53  ;;  %v3778_v53 = vld [vmem:[#allocation9 + $0xc0] ss:$8 sps:$4 sm:$0xff]  }
0x1227   :  { %v3864_v54 = vpop.eup %3863 }
0x1228   :  { %v2270_v11 = vsel %vm744_vm7, %v3864_v54, 0.0 }
0x1229   :  { %2271 = vadd.xlane.f32.xlu1 %v2270_v11  ;;  %v3783_v11 = vld [vmem:[#allocation9 + $0xb4] ss:$8 sps:$4 sm:$0xff]  }
0x122d   :  { %2280 = vrot.lane.b32.xlu0 %v4464_v36, %s4038_s1 }
0x123a   :  { %2329 = vrot.lane.b32.xlu1 %v1934_v15, %s4038_s1  ;;  %v3765_v15 = vld [vmem:[#allocation7 + $0x58] sm:$0xff]  }
0x12a0   :  { %v2269_v55 = vpop.xlane.xlu0 %2268 }
0x12a1   :  { %3865 = vrcp.f32 %v2269_v55  ;;  %v3781_v55 = vld [vmem:[#allocation9 + $0xb0] ss:$8 sps:$4 sm:$0xff]  }
0x12a4   :  { %v2281_v59 = vpop.permute.xlu0 %2280 }
0x12a5   :  { %v2286_v60 = vsel %vm772_vm6, %v2281_v59, 0  ;;  %v3786_v59 = vld [vmem:[#allocation9 + $0xa4] ss:$8 sps:$4 sm:$0xff]  }
0x12a6   :  { %3561 = vmatpush3.bf16.msra.mxu0 %v2286_v60  ;;  %v3784_v60 = vld [vmem:[#allocation9 + $0xa0] ss:$8 sps:$4 sm:$0xff]  }
0x12a7   :  { %3572 = vmatprep.subr.bf16.mxu0 %v4047_v1 }
0x12ae   :  { %v3866_v61 = vpop.eup %3865 }
0x12af   :  { %v2275_v62 = vmul.f32 %v3866_v61, %v3862_v49  ;;  %v3789_v61 = vld [vmem:[#allocation9 + $0x94] ss:$8 sps:$4 sm:$0xff]  }
0x12b1   :  { %v2277_v3 = vpack.c.bf16 %v2275_v62, %v2275_v62  ;;  %v3787_v62 = vld [vmem:[#allocation9 + $0x90] ss:$8 sps:$4 sm:$0xff]  }
0x12b2   :  { %v2272_v4 = vpop.xlane.xlu1 %2271 }
0x12b3   :  { %3867 = vrcp.f32 %v2272_v4  ;;  %3563 = vmatmul.mubr.msk.bf16.vlgmr.msra.gmra.mxu0 %vm744_vm7, %v2277_v3  ;;  %v3792_v3 = vld [vmem:[#allocation9 + $0x84] ss:$8 sps:$4 sm:$0xff]   ;;  %v3790_v4 = vld [vmem:[#allocation9 + $0x80] ss:$8 sps:$4 sm:$0xff]  }
0x12b4   :  { %3588 = vmatprep.mubr.msk.bf16.mxu0 %vm4048_vm0, %v4047_v1  ;;  %3573 = vmatpush3.bf16.msra.mxu0 %v3761_v9 }
0x12b5   :  { %3574 = vmatprep.subr.bf16.mxu0 %v4047_v1 }
0x12b6   :  { %v2330_v36 = vpop.permute.xlu1 %2329 }
0x12b7   :  { %v2335_v5 = vsel %vm772_vm6, %v2330_v36, 0 }
0x12b8   :  { %3567 = vmatpush3.bf16.msra.mxu1 %v2335_v5  ;;  %3575 = vmatpush3.bf16.msra.mxu0 %v3762_v10 }
0x12b9   :  { %3576 = vmatprep.subr.bf16.mxu0 %v4047_v1 }
0x12bc   :  { %3577 = vmatpush3.bf16.msra.mxu0 %v3763_v12 }
0x12bd   :  { %3578 = vmatprep.subr.bf16.mxu0 %v4047_v1 }
0x12c0   :  { %v3868_v6 = vpop.eup %3867  ;;  %3579 = vmatpush3.bf16.msra.mxu0 %v3764_v2  ;;  %v3216_v2 = vld [vmem:[%s4598_s11 + $0x1] ss:$0 sm:$0xff] }
0x12c1   :  { %v2276_v7 = vmul.f32 %v3868_v6, %v3864_v54  ;;  %3580 = vmatprep.subr.bf16.mxu0 %v4047_v1  ;;  %v3780_v54 = vld [vmem:[#allocation9 + $0xc4] ss:$8 sps:$4 sm:$0xff]  }
0x12c3   :  { %v2278_v8 = vpack.c.bf16 %v2276_v7, %v2276_v7 }
0x12c4   :  { %3581 = vmatpush3.bf16.msra.mxu0 %v3765_v15 }
0x12c5   :  { %3569 = vmatmul.mubr.msk.bf16.vlgmr.msra.gmra.mxu1 %vm744_vm7, %v2278_v8  ;;  %3582 = vmatprep.subr.bf16.mxu0 %v4047_v1 }
0x12c6   :  { %2689 = vmatprep.mubr.bf16.mxu1 %v4046_v0  ;;  %v3767_v0 = vld [vmem:[#allocation7 + $0x48] sm:$0xff]  }
0x12c8   :  { %3583 = vmatpush3.bf16.msra.mxu0 %v3766_v58 }
0x12c9   :  { %3584 = vmatprep.subr.bf16.mxu0 %v4047_v1 }
0x12cc   :  { %3585 = vmatpush3.bf16.msra.mxu0 %v3767_v0 }
0x12cd   :  { %3586 = vmatprep.subr.bf16.mxu0 %v4047_v1 }
0x12d0   :  { %3587 = vmatpush3.bf16.msra.mxu0 %v3768_v23 }
0x1373   :  { %v2322_v17 = vpop.f32.mrf.mxu0 }
0x1375   :  { %v3564_v18 = vpop.f32.mrf.mxu0 }
0x1377   :  { %v2325_v19 = vpop.f32.mrf.mxu0 }
0x1379   :  { %v3565_v20 = vpop.f32.mrf.mxu0 }
0x1385   :  { %v2371_v26 = vpop.f32.mrf.mxu1 }
0x1386   :  { %v3636_v28 = vpack.i.bf16 %v2371_v26, %v2322_v17  ;;  %v3217_v17 = vld [vmem:[%s4599_s12 + $0x1] ss:$0 sm:$0xff]  ;;  %v3793_v26 = vld [vmem:[#allocation10 + $0xf8] sm:$0xff]  }
0x1387   :  { %v3570_v21 = vpop.f32.mrf.mxu1  ;;  %3365 = vmatprep.subr.bf16.mxu0 %v3793_v26 }
0x1388   :  { %3637 = vrot.lane.b32.xlu1 %v3636_v28, %s4038_s1  ;;  %v3794_v28 = vld [vmem:[#allocation10 + $0xb8] sm:$0xff]   ;;  %v3795_v21 = vld [vmem:[#allocation10 + $0xf0] sm:$0xff]  }
0x1389   :  { %v2374_v29 = vpop.f32.mrf.mxu1 }
0x138a   :  { %v3796_v29 = vld [vmem:[#allocation10 + $0xb0] sm:$0xff]  }
0x138b   :  { %v3571_v30 = vpop.f32.mrf.mxu1 }
0x138c   :  { %v3797_v30 = vld [vmem:[#allocation10 + $0xe8] sm:$0xff]  }
0x13fa   :  { %v3638_v50 = vpop.permute.xlu1 %3637 }
0x13fb   :  { %v3640_v32 = vunpack.i.h.bf16 %v3638_v50  ;;  %v3639_v56 = vunpack.i.l.bf16 %v3638_v50  ;;  %v3798_v50 = vld [vmem:[#allocation10 + $0xa8] sm:$0xff]  }
0x13fd   :  { %v2386_v33 = vsel %vm647_vm5, %v4506_v34, %v3640_v32  ;;  %v2385_v57 = vsel %vm647_vm5, %v4502_v22, %v3639_v56  ;;  %v3771_v22 = vld [vmem:[#allocation9 + $0xf4] ss:$8 sps:$4 sm:$0xff]   ;;  %v3799_v32 = vld [vmem:[#allocation10 + $0xe0] sm:$0xff]  }
0x13fe   :  { %v2387_v16 = vpack.c.bf16 %v2386_v33, %v2385_v57  ;;  %2657 = vmatprep.subr.bf16.mxu1 %v3771_v22  ;;  %v3800_v56 = vld [vmem:[#allocation10 + $0xa0] sm:$0xff]   ;;  %v3801_v33 = vld [vmem:[#allocation10 + $0xd8] sm:$0xff]  }
0x13ff   :  { %2658 = vmatpush1.bf16.msra.mxu1 %v3769_v43  ;;  %v3802_v57 = vld [vmem:[#allocation10 + $0x98] sm:$0xff]  }
0x1400   :  { %3589 = vmatmul.mubr.bf16.vlgmr.msra.gmra.mxu0 %v2387_v16  ;;  %2659 = vmatprep.subr.bf16.mxu1 %v3774_v51  ;;  %v3803_v16 = vld [vmem:[#allocation10 + $0xd0] sm:$0xff]  }
0x1401   :  { %3366 = vmatpush3.bf16.msra.mxu0 %v3794_v28 }
0x1402   :  { %3367 = vmatprep.subr.bf16.mxu0 %v3795_v21 }
0x1403   :  { %2660 = vmatpush1.bf16.msra.mxu1 %v3772_v39 }
0x1405   :  { %3368 = vmatpush3.bf16.msra.mxu0 %v3796_v29 }
0x1406   :  { %3369 = vmatprep.subr.bf16.mxu0 %v3797_v30 }
0x1409   :  { %3370 = vmatpush3.bf16.msra.mxu0 %v3798_v50  ;;  %v3236_v50 = vld [vmem:[%s4603_s16 + $0x1] ss:$0 sm:$0xff] }
0x140a   :  { %3371 = vmatprep.subr.bf16.mxu0 %v3799_v32 }
0x140d   :  { %3372 = vmatpush3.bf16.msra.mxu0 %v3800_v56 }
0x140e   :  { %3373 = vmatprep.subr.bf16.mxu0 %v3801_v33 }
0x1411   :  { %3374 = vmatpush3.bf16.msra.mxu0 %v3802_v57 }
0x1412   :  { %3375 = vmatprep.subr.bf16.mxu0 %v3803_v16 }
0x14c0   :  { %v2495_v27 = vpop.f32.mrf.mxu0 }
0x14c1   :  { %v2496_v35 = vadd.f32 %v3205_v24, %v2495_v27  ;;  %v3805_v27 = vld [vmem:[#allocation10 + $0xc8] sm:$0xff]  }
0x14c2   :  { %v3590_v37 = vpop.f32.mrf.mxu0 }
0x14c3   :  { %v2502_v40 = vadd.f32 %v2496_v35, %v4438_v13  ;;  %v3806_v35 = vld [vmem:[#allocation10 + $0x88] sm:$0xff]   ;;  %v3807_v37 = vld [vmem:[#allocation10 + $0xc0] sm:$0xff]  }
0x14c4   :  { %v2498_v41 = vpop.f32.mrf.mxu0 }
0x14c5   :  { %v2499_v38 = vadd.f32 %v3205_v24, %v2498_v41  ;;  %2508 = vadd.xlane.f32.xlu0 %v2502_v40  ;;  %v3804_v24 = vld [vmem:[#allocation10 + $0x90] sm:$0xff]   ;;  %v3218_v41 = vld [vmem:[%s4601_s14 + $0x2] sm:$0x3] }
0x14c6   :  { %v3591_v42 = vpop.f32.mrf.mxu0  ;;  %3376 = vmatpush3.bf16.msra.mxu0 %v3804_v24 }
0x14c7   :  { %v2503_v34 = vadd.f32 %v2499_v38, %v4440_v14  ;;  %v3777_v14 = vld [vmem:[#allocation9 + $0xd4] ss:$8 sps:$4 sm:$0xff]   ;;  %3377 = vmatprep.subr.bf16.mxu0 %v3805_v27  ;;  %v2570_v38 = vrot.slane %v3218_v41, %v4279_v31  ;;  %v2574_v42 = vrot.slane %v3218_v41, %v4271_v25 }
0x14c8   :  { %2661 = vmatprep.subr.bf16.mxu1 %v3777_v14 }
0x14c9   :  { %2510 = vadd.xlane.f32.xlu1 %v2503_v34  ;;  %2662 = vmatpush1.bf16.msra.mxu1 %v3775_v52 }
0x14ca   :  { %2663 = vmatprep.subr.bf16.mxu1 %v3780_v54  ;;  %3378 = vmatpush3.bf16.msra.mxu0 %v3806_v35 }
0x14cb   :  { %3379 = vmatprep.subr.bf16.mxu0 %v3807_v37 }
0x14cd   :  { %2664 = vmatpush1.bf16.msra.mxu1 %v3778_v53 }
0x14ce   :  { %2665 = vmatprep.subr.bf16.mxu1 %v3783_v11 }
0x14d1   :  { %2666 = vmatpush1.bf16.msra.mxu1 %v3781_v55 }
0x14d2   :  { %2667 = vmatprep.subr.bf16.mxu1 %v3786_v59 }
0x14d5   :  { %2668 = vmatpush1.bf16.msra.mxu1 %v3784_v60 }
0x14d6   :  { %2669 = vmatprep.subr.bf16.mxu1 %v3789_v61 }
0x14d9   :  { %2670 = vmatpush1.bf16.msra.mxu1 %v3787_v62 }
0x14da   :  { %2671 = vmatprep.subr.bf16.mxu1 %v3792_v3 }
0x14dd   :  { %2672 = vmatpush1.bf16.msra.mxu1 %v3790_v4 }
0x14de   :  { %3592 = vmatprep.subr.bf16.mxu1 %v4047_v1 }
0x154e   :  { %v2509_v44 = vpop.xlane.xlu0 %2508 }
0x154f   :  { %v2512_v63 = vmul.f32 0.0078125, %v2509_v44 }
0x1551   :  { %v2514_v45 = vsub.f32 %v2502_v40, %v2512_v63  ;;  %v3808_v40 = vld [vmem:[#allocation10 + $0x80] sm:$0xff]  }
0x1552   :  { %v2511_v46 = vpop.xlane.xlu1 %2510  ;;  %3380 = vmatpush3.bf16.msra.mxu0 %v3808_v40  ;;  %v3809_v40 = vld [vmem:[#allocation12 + $0x38] sm:$0xff]  }
0x1553   :  { %v2513_v47 = vmul.f32 0.0078125, %v2511_v46  ;;  %v2516_v48 = vmul.f32 %v2514_v45, %v2514_v45 }
0x1555   :  { %v2515_v49 = vsub.f32 %v2503_v34, %v2513_v47  ;;  %2518 = vadd.xlane.f32.xlu0 %v2516_v48 }
0x1557   :  { %v2517_v13 = vmul.f32 %v2515_v49, %v2515_v49 }
0x1559   :  { %2520 = vadd.xlane.f32.xlu0 %v2517_v13 }
0x15de   :  { %v2519_v36 = vpop.xlane.xlu0 %2518 }
0x15df   :  { %v2522_v5 = vmul.f32 0.0078125, %v2519_v36 }
0x15e1   :  { %v2524_v6 = vadd.f32 1e-12, %v2522_v5 }
0x15e2   :  { %v2521_v7 = vpop.xlane.xlu0 %2520 }
0x15e3   :  { %3869 = vrsqrt.f32 %v2524_v6  ;;  %v2523_v8 = vmul.f32 0.0078125, %v2521_v7 }
0x15e5   :  { %v2525_v9 = vadd.f32 1e-12, %v2523_v8 }
0x15e7   :  { %3871 = vrsqrt.f32 %v2525_v9 }
0x15f0   :  { %v3870_v10 = vpop.eup %3869 }
0x15f1   :  { %v2528_v12 = vmul.f32 %v3870_v10, %v2514_v45 }
0x15f3   :  { %v2536_v0 = vmul.f32 %v3216_v2, %v2528_v12 }
0x15f4   :  { %v3872_v15 = vpop.eup %3871 }
0x15f5   :  { %v2529_v58 = vmul.f32 %v3872_v15, %v2515_v49  ;;  %v4547_v19 = vadd.f32 %v3217_v17, %v2536_v0 }
0x15f7   :  { %v2537_v18 = vmul.f32 %v3216_v2, %v2529_v58 }
0x15f9   :  { %v4549_v20 = vadd.f32 %v3217_v17, %v2537_v18 }
0x15fb   :  { %v2546_v23 = vpack.c.bf16 %v4549_v20, %v4547_v19 }
0x15fd   :  { %2690 = vmatmul.mubr.bf16.vlgmr.msra.gmra.mxu1 %v2546_v23 }
0x15fe   :  { %3608 = vmatprep.mubr.msk.bf16.mxu1 %vm4048_vm0, %v4047_v1  ;;  %3593 = vmatpush3.bf16.msra.mxu1 %v3809_v40 }
0x15ff   :  { %3594 = vmatprep.subr.bf16.mxu1 %v4047_v1 }
0x16bd   :  { %v2691_v34 = vpop.f32.mrf.mxu1 }
0x16be   :  { %v2692_v43 = vadd.f32 %v2691_v34, %v2570_v38 }
0x16bf   :  { %v2693_v22 = vpop.f32.mrf.mxu1 }
0x16c0   :  { %v2700_v44 = vmul.f32 %v2692_v43, %v2692_v43  ;;  %v2694_v63 = vadd.f32 %v2693_v22, %v2574_v42 }
0x16c1   :  { %v2695_v45 = vpop.f32.mrf.mxu1 }
0x16c2   :  { %v2704_v46 = vmul.f32 %v2700_v44, %v2692_v43  ;;  %v2701_v47 = vmul.f32 %v2694_v63, %v2694_v63  ;;  %v2696_v48 = vadd.f32 %v2695_v45, %v2570_v38  ;;  %v3812_v45 = vld [vmem:[#allocation12 + $0x20] sm:$0xff]  }
0x16c3   :  { %v2697_v49 = vpop.f32.mrf.mxu1 }
0x16c4   :  { %v2708_v13 = vmul.f32 0.044715, %v2704_v46  ;;  %v2705_v51 = vmul.f32 %v2701_v47, %v2694_v63  ;;  %v2702_v39 = vmul.f32 %v2696_v48, %v2696_v48  ;;  %v2698_v14 = vadd.f32 %v2697_v49, %v2574_v42  ;;  %v3813_v46 = vld [vmem:[#allocation12 + $0x18] sm:$0xff]   ;;  %v3814_v47 = vld [vmem:[#allocation12 + $0x10] sm:$0xff]   ;;  %v3816_v49 = vld [vmem:[#allocation12] sm:$0xff]  }
0x16c6   :  { %v2712_v52 = vadd.f32 %v2708_v13, %v2692_v43  ;;  %v2709_v53 = vmul.f32 0.044715, %v2705_v51  ;;  %v2706_v54 = vmul.f32 %v2702_v39, %v2696_v48  ;;  %v2703_v31 = vmul.f32 %v2698_v14, %v2698_v14 }
0x16c8   :  { %v2716_v11 = vmul.f32 0.7978846, %v2712_v52  ;;  %v2713_v25 = vadd.f32 %v2709_v53, %v2694_v63  ;;  %v2710_v55 = vmul.f32 0.044715, %v2706_v54  ;;  %v2707_v59 = vmul.f32 %v2703_v31, %v2698_v14 }
0x16ca   :  { %v2717_v60 = vmul.f32 0.7978846, %v2713_v25  ;;  %v2714_v61 = vadd.f32 %v2710_v55, %v2696_v48  ;;  %v2711_v62 = vmul.f32 0.044715, %v2707_v59  ;;  %3873 = vtanh.f32 %v2716_v11  ;;  %v3255_v11 = vld [vmem:[%s4604_s17 + $0x1] ss:$0 sm:$0xff] }
0x16cc   :  { %3875 = vtanh.f32 %v2717_v60  ;;  %v2718_v3 = vmul.f32 0.7978846, %v2714_v61  ;;  %v2715_v4 = vadd.f32 %v2711_v62, %v2698_v14 }
0x16ce   :  { %3877 = vtanh.f32 %v2718_v3  ;;  %v2719_v36 = vmul.f32 0.7978846, %v2715_v4  ;;  %v3257_v4 = vld [vmem:[%s4607_s20] ss:$0 sm:$0xff] }
0x16d0   :  { %3879 = vtanh.f32 %v2719_v36 }
0x16d7   :  { %v3874_v5 = vpop.eup %3873 }
0x16d8   :  { %v2724_v9 = vadd.f32 1.0, %v3874_v5 }
0x16d9   :  { %v3876_v6 = vpop.eup %3875 }
0x16da   :  { %v2725_v7 = vadd.f32 1.0, %v3876_v6  ;;  %v2728_v0 = vmul.f32 0.5, %v2724_v9 }
0x16db   :  { %v3878_v8 = vpop.eup %3877 }
0x16dc   :  { %v2726_v10 = vadd.f32 1.0, %v3878_v8  ;;  %v2729_v58 = vmul.f32 0.5, %v2725_v7  ;;  %v2732_v28 = vmul.f32 %v2728_v0, %v2692_v43 }
0x16dd   :  { %v3880_v12 = vpop.eup %3879 }
0x16de   :  { %v2730_v2 = vmul.f32 0.5, %v2726_v10  ;;  %v2727_v15 = vadd.f32 1.0, %v3880_v12  ;;  %v2733_v23 = vmul.f32 %v2729_v58, %v2694_v63 }
0x16e0   :  { %v2731_v17 = vmul.f32 0.5, %v2727_v15  ;;  %v2734_v18 = vmul.f32 %v2730_v2, %v2696_v48  ;;  %v3815_v48 = vld [vmem:[#allocation12 + $0x8] sm:$0xff]  }
0x16e2   :  { %v2735_v26 = vmul.f32 %v2731_v17, %v2698_v14  ;;  %v2736_v29 = vpack.c.bf16 %v2734_v18, %v2732_v28 }
0x16e4   :  { %v2737_v21 = vpack.c.bf16 %v2735_v26, %v2733_v23 }
0x16e6   :  { %2907 = vmatprep.mubr.bf16.mxu0 %v2737_v21 }
0x16e7   :  { %2908 = vmatmul.mubr.bf16.vlgmr.msra.gmra.mxu0 %v2736_v29 }
0x17a7   :  { %v3381_v30 = vpop.f32.mrf.mxu0 }
0x17a9   :  { %v3382_v32 = vpop.f32.mrf.mxu0 }
0x17aa   :  { %v3383_v56 = vadd.f32 %v3382_v32, %v3381_v30 }
0x17ab   :  { %v3384_v33 = vpop.f32.mrf.mxu0 }
0x17ac   :  { %v2910_v57 = vadd.f32 %v3383_v56, %v3236_v50 }
0x17ad   :  { %v3385_v16 = vpop.f32.mrf.mxu0 }
0x17ae   :  { %v3386_v24 = vadd.f32 %v3385_v16, %v3384_v33  ;;  %v2916_v27 = vadd.f32 %v2910_v57, %v4547_v19  ;;  %v3810_v19 = vld [vmem:[#allocation12 + $0x30] sm:$0xff]  }
0x17af   :  { %3595 = vmatpush3.bf16.msra.mxu1 %v3810_v19 }
0x17b0   :  { %v2913_v35 = vadd.f32 %v3386_v24, %v3236_v50  ;;  %2922 = vadd.xlane.f32.xlu1 %v2916_v27  ;;  %3596 = vmatprep.subr.bf16.mxu1 %v4047_v1 }
0x17b2   :  { %v2917_v37 = vadd.f32 %v2913_v35, %v4549_v20  ;;  %v3811_v20 = vld [vmem:[#allocation12 + $0x28] sm:$0xff]  }
0x17b3   :  { %3597 = vmatpush3.bf16.msra.mxu1 %v3811_v20 }
0x17b4   :  { %2924 = vadd.xlane.f32.xlu0 %v2917_v37  ;;  %3598 = vmatprep.subr.bf16.mxu1 %v4047_v1 }
0x17b7   :  { %3599 = vmatpush3.bf16.msra.mxu1 %v3812_v45 }
0x17b8   :  { %3600 = vmatprep.subr.bf16.mxu1 %v4047_v1 }
0x17bb   :  { %3601 = vmatpush3.bf16.msra.mxu1 %v3813_v46 }
0x17bc   :  { %3602 = vmatprep.subr.bf16.mxu1 %v4047_v1 }
0x17bf   :  { %3603 = vmatpush3.bf16.msra.mxu1 %v3814_v47 }
0x17c0   :  { %3604 = vmatprep.subr.bf16.mxu1 %v4047_v1 }
0x17c3   :  { %3605 = vmatpush3.bf16.msra.mxu1 %v3815_v48 }
0x17c4   :  { %3606 = vmatprep.subr.bf16.mxu1 %v4047_v1  ;;  %v3256_v1 = vld [vmem:[%s4605_s18 + $0x1] ss:$0 sm:$0xff] }
0x17c7   :  { %3607 = vmatpush3.bf16.msra.mxu1 %v3816_v49 }
0x1839   :  { %v2923_v41 = vpop.xlane.xlu1 %2922 }
0x183a   :  { %v2926_v38 = vmul.f32 0.0078125, %v2923_v41 }
0x183c   :  { %v2928_v42 = vsub.f32 %v2916_v27, %v2926_v38 }
0x183d   :  { %v2925_v34 = vpop.xlane.xlu0 %2924 }
0x183e   :  { %v2927_v43 = vmul.f32 0.0078125, %v2925_v34  ;;  %v2930_v22 = vmul.f32 %v2928_v42, %v2928_v42 }
0x1840   :  { %v2929_v44 = vsub.f32 %v2917_v37, %v2927_v43  ;;  %2932 = vadd.xlane.f32.xlu1 %v2930_v22 }
0x1842   :  { %v2931_v63 = vmul.f32 %v2929_v44, %v2929_v44 }
0x1844   :  { %2934 = vadd.xlane.f32.xlu0 %v2931_v63 }
0x18c9   :  { %v2933_v13 = vpop.xlane.xlu1 %2932 }
0x18ca   :  { %v2936_v51 = vmul.f32 0.0078125, %v2933_v13 }
0x18cc   :  { %v2938_v39 = vadd.f32 1e-12, %v2936_v51 }
0x18cd   :  { %v2935_v14 = vpop.xlane.xlu0 %2934 }
0x18ce   :  { %3881 = vrsqrt.f32 %v2938_v39  ;;  %v2937_v52 = vmul.f32 0.0078125, %v2935_v14 }
0x18d0   :  { %v2939_v53 = vadd.f32 1e-12, %v2937_v52 }
0x18d2   :  { %3883 = vrsqrt.f32 %v2939_v53 }
0x18db   :  { %v3882_v54 = vpop.eup %3881 }
0x18dc   :  { %v2942_v31 = vmul.f32 %v3882_v54, %v2928_v42 }
0x18de   :  { %v2950_v59 = vmul.f32 %v3255_v11, %v2942_v31 }
0x18df   :  { %v3884_v25 = vpop.eup %3883 }
0x18e0   :  { %v2943_v55 = vmul.f32 %v3884_v25, %v2929_v44  ;;  %v2958_v61 = vadd.f32 %v3256_v1, %v2950_v59 }
0x18e2   :  { %v2951_v60 = vmul.f32 %v3255_v11, %v2943_v55 }
0x18e4   :  { %v2959_v62 = vadd.f32 %v3256_v1, %v2951_v60 }
0x18e6   :  { %v2960_v3 = vpack.c.bf16 %v2959_v62, %v2958_v61 }
0x18e8   :  { %3609 = vmatmul.mubr.bf16.vlgmr.msra.gmra.mxu1 %v2960_v3 }
0x19a8   :  { %v3066_v36 = vpop.f32.mrf.mxu1 }
0x19a9   :  { %v3067_v5 = vadd.f32 %v3257_v4, %v3066_v36 }
0x19aa   :  { %v3610_v6 = vpop.f32.mrf.mxu1 }
0x19ab   :  { %3073 = vst [vmem:[%s4608_s21] sm:$0xff] %v3067_v5 }
0x19ac   :  { %v3069_v7 = vpop.f32.mrf.mxu1 }
0x19ad   :  { %v3070_v8 = vadd.f32 %v3257_v4, %v3069_v7 }
0x19ae   :  { %v3611_v9 = vpop.f32.mrf.mxu1 }
0x19af   :  { %3074 = vst [vmem:[%s4608_s21 + $0x8] sm:$0xff] %v3070_v8 }
0x19b0   :  { %3079 = vsyncpa [#allocation3], 1 }
0x19b1   :  { %3080 = vsyncpa [#allocation5], 1 }
0x19b2   :  { %3081 = vsyncpa [#allocation8], 1 }
0x19b3   :  { %3082 = vsyncpa [#allocation11], 1 }

</bundles_post_ra>
